<compile_context>
chip_gen: v5e
topology: v5e:2x2
jax: 0.10.0
libtpu: 0.0.40
codegen_flags: <defaults>
</compile_context>

<pallas_src>
import functools
import math

import numpy as np
import jax
import jax.numpy as jnp
from jax.experimental import pallas as pl
from jax.experimental.pallas import tpu as pltpu

_LANE = 128  # every packed-output chunk sits on a 128-lane boundary (dense writeback)


def _round_up(x, m):
    return ((x + m - 1) // m) * m


def _pad2(a, rows, cols):
    pr, pc = rows - a.shape[0], cols - a.shape[1]
    if pr == 0 and pc == 0:
        return a
    return jnp.pad(a, ((0, pr), (0, pc)))


# ----------------- kernel 1: encoders + attention fusion (packed output) -----------------
def _enc_attn_kernel(num_mod, tile_k, x_resident, *refs):
    M = num_mod
    it = iter(refs)
    x_refs = [next(it) for _ in range(M)]       # (tk, F_m) streamed or (Np, F_m) resident
    adj_refs = [next(it) for _ in range(M)]     # (tm, tk)
    wenc_refs = [next(it) for _ in range(M)]    # (F_m, D)
    w_omega_ref = next(it)                      # (D, D)
    u_row_ref = next(it)                        # (1, D)
    packed_ref = next(it)                       # (tm, (M+2)*128) f32, resident across k
    acc_refs = [next(it) for _ in range(M)]     # (tm, F_m) f32 scratch

    D = w_omega_ref.shape[0]
    k = pl.program_id(1)
    nk = pl.num_programs(1)

    @pl.when(k == 0)
    def _init():
        for m in range(M):
            acc_refs[m][...] = jnp.zeros(acc_refs[m].shape, acc_refs[m].dtype)

    # Stream the (tm, tk) adjacency tiles -- the only O(N^2) traffic -- and accumulate
    # adj_m @ x_m over the narrow F_m columns in f32.
    for m in range(M):
        if x_resident:
            start = pl.multiple_of(k * tile_k, tile_k)
            xm = x_refs[m][pl.ds(start, tile_k), :]
        else:
            xm = x_refs[m][...]
        acc_refs[m][...] += jnp.dot(adj_refs[m][...], xm,
                                    preferred_element_type=jnp.float32)

    @pl.when(k == nk - 1)
    def _finalize():
        # Per-modality loop (no (M*tm, D) batching / big concatenates): bounded live
        # ranges.  emb_m is stored to its 128-lane-aligned chunk immediately and
        # reloaded when forming the attention-weighted combination.
        vu_cols = []
        for m in range(M):
            emb = jnp.dot(acc_refs[m][...].astype(wenc_refs[m].dtype),
                          wenc_refs[m][...],
                          preferred_element_type=jnp.float32)             # (tm, D)
            packed_ref[:, m * _LANE:m * _LANE + D] = emb
            v = jnp.tanh(jnp.dot(emb.astype(w_omega_ref.dtype), w_omega_ref[...],
                                 preferred_element_type=jnp.float32))     # (tm, D)
            # (D, 1) matmul replaced by a VPU lane reduction against the u_omega row.
            vu_cols.append(jnp.sum(v * u_row_ref[...].astype(jnp.float32),
                                   axis=-1, keepdims=True))               # (tm, 1)

        vu = jnp.concatenate(vu_cols, axis=-1)                            # (tm, M)
        vmax = jnp.max(vu, axis=-1, keepdims=True)
        ee = jnp.exp(vu - vmax)
        alpha = ee / jnp.sum(ee, axis=-1, keepdims=True)                  # (tm, M)
        packed_ref[:, (M + 1) * _LANE:(M + 1) * _LANE + M] = alpha

        comb = jnp.zeros((packed_ref.shape[0], D), jnp.float32)
        for m in range(M):
            emb_m = packed_ref[:, m * _LANE:m * _LANE + D]                # reload
            comb = comb + emb_m * alpha[:, m:m + 1]
        packed_ref[:, M * _LANE:M * _LANE + D] = comb


# ------------- kernel 2: decoders, dec_m = (adj_m @ comb) @ W_dec_m (packed) -------------
def _decoder_kernel(num_mod, *refs):
    M = num_mod
    it = iter(refs)
    comb_ref = next(it)                          # (tk, D), shared RHS for all modalities
    adj_refs = [next(it) for _ in range(M)]      # (tm, tk)
    wdec_refs = [next(it) for _ in range(M)]     # (D, F_m)
    packed_ref = next(it)                        # (tm, M*128) f32, resident across k
    acc_refs = [next(it) for _ in range(M)]      # (tm, D) f32 scratch

    k = pl.program_id(1)
    nk = pl.num_programs(1)

    @pl.when(k == 0)
    def _init():
        for m in range(M):
            acc_refs[m][...] = jnp.zeros(acc_refs[m].shape, acc_refs[m].dtype)

    cb = comb_ref[...]
    for m in range(M):
        acc_refs[m][...] += jnp.dot(adj_refs[m][...], cb,
                                    preferred_element_type=jnp.float32)

    @pl.when(k == nk - 1)
    def _finalize():
        for m in range(M):
            f = wdec_refs[m].shape[1]
            dec = jnp.dot(acc_refs[m][...].astype(wdec_refs[m].dtype),
                          wdec_refs[m][...],
                          preferred_element_type=jnp.float32)              # (tm, F_m)
            packed_ref[:, m * _LANE:m * _LANE + f] = dec


# ------------------------------------ host wrapper ------------------------------------
def encoder_omics_forward(params, omics_list, adj_list, *,
                          block_rows=512, block_cols=512,
                          compute_dtype=jnp.bfloat16,
                          row_semantics="parallel",
                          adj_buffers=2,
                          x_resident_bytes=8 * 1024 * 1024,
                          vmem_limit_bytes=None):
    """Forward pass of Encoder_omics.

    compute_dtype: dtype of the streamed adjacency / feature / weight operands (MXU
      inputs).  All accumulation and the tanh/softmax math stay in f32.  bf16 (default)
      halves the dominant N^2 HBM traffic; pass jnp.float32 for bit-closer results.
    block_rows/block_cols: adjacency tile (sweep 512-1024 at realistic N; both kernels
      are HBM-bound).  N is zero-padded up to a multiple of the tiles.
    row_semantics: "parallel"; on v7x pass pltpu.CORE_PARALLEL to shard row tiles
      across the two TensorCores.
    adj_buffers: pipeline depth for the adjacency stream (pl.Buffered); 2 = default.
    x_resident_bytes: keep per-modality features fully VMEM-resident when they fit.
    vmem_limit_bytes: leave None (compiler default); do NOT request 64 MiB on v7x.
    """
    M = len(omics_list)
    N = omics_list[0].shape[0]
    D = int(params["w_omega"].shape[0])
    feats = [int(x.shape[1]) for x in omics_list]
    cd = compute_dtype
    icd = jnp.dtype(cd).itemsize

    assert block_rows % 128 == 0 and block_cols % 128 == 0, \
        "block_rows/block_cols must be multiples of 128"
    tm = min(block_rows, _round_up(N, 128))
    tk = min(block_cols, _round_up(N, 128))
    Np = _round_up(N, math.lcm(tm, tk))
    grid = (Np // tm, Np // tk)

    # Zero-padding the reduction (column) dim is exact for the matmuls; padded rows
    # produce zero embeddings / uniform alpha and are sliced off below.
    xs = [_pad2(x.astype(cd), Np, x.shape[1]) for x in omics_list]
    adjs = [_pad2(a.astype(cd), Np, Np) for a in adj_list]
    wenc = [w.astype(cd) for w in params["enc_w"]]
    wdec = [w.astype(cd) for w in params["dec_w"]]
    w_omega = params["w_omega"].astype(cd)
    u_row = params["u_omega"].reshape(1, D).astype(cd)

    def adj_spec():
        if adj_buffers is None or adj_buffers == 2:
            return pl.BlockSpec((tm, tk), lambda i, k: (i, k))
        return pl.BlockSpec((tm, tk), lambda i, k: (i, k),
                            pipeline_mode=pl.Buffered(adj_buffers))

    x_resident = (Np * sum(feats) * icd) <= x_resident_bytes
    if x_resident:
        x_specs = [pl.BlockSpec((Np, f), lambda i, k: (0, 0)) for f in feats]
    else:
        x_specs = [pl.BlockSpec((tk, f), lambda i, k: (k, 0)) for f in feats]

    sem = (row_semantics, "arbitrary")

    # ------------------- kernel 1: encoders + attention fusion -------------------
    P1 = (M + 2) * _LANE   # [emb_0 | ... | emb_{M-1} | comb | alpha], 128 lanes per chunk
    in_specs1 = (x_specs
                 + [adj_spec() for _ in range(M)]
                 + [pl.BlockSpec((f, D), lambda i, k: (0, 0)) for f in feats]
                 + [pl.BlockSpec((D, D), lambda i, k: (0, 0)),
                    pl.BlockSpec((1, D), lambda i, k: (0, 0))])
    flops1 = int(sum(2 * Np * Np * f + 2 * Np * f * D for f in feats)
                 + 2 * M * Np * D * D + 6 * M * Np * D)
    bytes1 = int(icd * (M * Np * Np + sum(Np * f + f * D for f in feats) + D * D + D)
                 + 4 * Np * P1)

    packed1 = pl.pallas_call(
        functools.partial(_enc_attn_kernel, M, tk, x_resident),
        out_shape=jax.ShapeDtypeStruct((Np, P1), jnp.float32),
        grid_spec=pltpu.PrefetchScalarGridSpec(
            num_scalar_prefetch=0,
            grid=grid,
            in_specs=in_specs1,
            out_specs=pl.BlockSpec((tm, P1), lambda i, k: (i, 0)),
            scratch_shapes=[pltpu.VMEM((tm, f), jnp.float32) for f in feats]),
        compiler_params=pltpu.CompilerParams(
            dimension_semantics=sem, vmem_limit_bytes=vmem_limit_bytes),
        cost_estimate=pl.CostEstimate(
            flops=flops1, transcendentals=int(M * Np * D + M * Np),
            bytes_accessed=bytes1),
    )(*xs, *adjs, *wenc, w_omega, u_row)

    embeddings_within = [packed1[:N, m * _LANE:m * _LANE + D] for m in range(M)]
    emb_combined = packed1[:N, M * _LANE:M * _LANE + D]
    alpha_omics = packed1[:N, (M + 1) * _LANE:(M + 1) * _LANE + M]

    # Padded rows of comb are exactly zero, so the padded slab feeds kernel 2 directly.
    comb_cd = packed1[:, M * _LANE:M * _LANE + D].astype(cd)

    # ---------------------------- kernel 2: decoders ----------------------------
    P2 = M * _LANE
    in_specs2 = ([pl.BlockSpec((tk, D), lambda i, k: (k, 0))]
                 + [adj_spec() for _ in range(M)]
                 + [pl.BlockSpec((D, f), lambda i, k: (0, 0)) for f in feats])
    flops2 = int(2 * M * Np * Np * D + sum(2 * Np * D * f for f in feats))
    bytes2 = int(icd * (M * Np * Np + Np * D + sum(D * f for f in feats)) + 4 * Np * P2)

    packed2 = pl.pallas_call(
        functools.partial(_decoder_kernel, M),
        out_shape=jax.ShapeDtypeStruct((Np, P2), jnp.float32),
        grid_spec=pltpu.PrefetchScalarGridSpec(
            num_scalar_prefetch=0,
            grid=grid,
            in_specs=in_specs2,
            out_specs=pl.BlockSpec((tm, P2), lambda i, k: (i, 0)),
            scratch_shapes=[pltpu.VMEM((tm, D), jnp.float32) for _ in range(M)]),
        compiler_params=pltpu.CompilerParams(
            dimension_semantics=sem, vmem_limit_bytes=vmem_limit_bytes),
        cost_estimate=pl.CostEstimate(
            flops=flops2, transcendentals=0, bytes_accessed=bytes2),
    )(comb_cd, *adjs, *wdec)

    decoded = [packed2[:N, m * _LANE:m * _LANE + feats[m]] for m in range(M)]
    return embeddings_within, emb_combined, alpha_omics, decoded


# ----------------------------------- pure-JAX reference -----------------------------------
def reference_forward(params, omics_list, adj_list):
    embs = [adj @ (x @ w)
            for x, adj, w in zip(omics_list, adj_list, params["enc_w"])]
    emb_t = jnp.stack(embs, axis=1)                       # (N, M, D)
    v = jnp.tanh(emb_t @ params["w_omega"])
    vu = (v @ params["u_omega"])[..., 0]                  # (N, M)
    alpha = jax.nn.softmax(vu, axis=1)
    comb = jnp.sum(emb_t * alpha[..., None], axis=1)
    decs = [adj @ (comb @ w) for adj, w in zip(adj_list, params["dec_w"])]
    return embs, comb, alpha, decs


def xavier_uniform(key, shape):
    fan_in, fan_out = shape[0], shape[1]
    limit = float(np.sqrt(6.0 / (fan_in + fan_out)))
    return jax.random.uniform(key, shape, jnp.float32, -limit, limit)


if __name__ == "__main__":
    # args: modalities_in_feats=[8, 12], out_feat=32, N=300 nodes (deliberately not a
    # multiple of any tile size -> exercises the zero-padding path).
    modalities_in_feats = [8, 12]
    out_feat = 32
    N = 300

    key = jax.random.PRNGKey(0)
    keys = jax.random.split(key, 16)
    ki = iter(keys)

    params = {
        "enc_w": [xavier_uniform(next(ki), (f, out_feat)) for f in modalities_in_feats],
        "dec_w": [xavier_uniform(next(ki), (out_feat, f)) for f in modalities_in_feats],
        "w_omega": xavier_uniform(next(ki), (out_feat, out_feat)),
        "u_omega": xavier_uniform(next(ki), (out_feat, 1)),
    }
    omics_list = [jax.random.normal(next(ki), (N, f), jnp.float32)
                  for f in modalities_in_feats]
    adj_list = []
    for _ in modalities_in_feats:
        a = jax.random.uniform(next(ki), (N, N), jnp.float32)
        adj_list.append((a + a.T) * 0.5)          # dense symmetric "adjacency"

    refs = reference_forward(params, omics_list, adj_list)

    # (1) f32 compute, 128x128 tiles -> grid (3, 3): exercises padding, multi-step
    #     reduction with pl.when init/finalize, and the streamed-x code path.
    #     atol=2e-3 (not 1e-4) because both matmul chains are reassociated
    #     ((adj@x)@W_enc and (adj@comb)@W_dec); relative agreement is ~1e-5.
    outs = encoder_omics_forward(params, omics_list, adj_list,
                                 block_rows=128, block_cols=128,
                                 compute_dtype=jnp.float32,
                                 x_resident_bytes=0)
    outs = jax.block_until_ready(outs)
    for o, r in zip(jax.tree_util.tree_leaves(outs), jax.tree_util.tree_leaves(refs)):
        np.testing.assert_allclose(np.asarray(o), np.asarray(r), rtol=1e-4, atol=2e-3)

    # (2) default performance configuration: bf16 streams, 512-wide tiles (capped to
    #     384 at this tiny N), VMEM-resident x.  Checked with a relative-norm metric
    #     (bf16 adjacency stream makes tight elementwise tolerances meaningless).
    outs_bf16 = encoder_omics_forward(params, omics_list, adj_list)
    outs_bf16 = jax.block_until_ready(outs_bf16)
    for o, r in zip(jax.tree_util.tree_leaves(outs_bf16),
                    jax.tree_util.tree_leaves(refs)):
        o = np.asarray(o, np.float32)
        r = np.asarray(r, np.float32)
        rel = np.linalg.norm(o - r) / (np.linalg.norm(r) + 1e-6)
        assert rel < 0.15, f"bf16 run deviates from reference: rel={rel}"

    print("KERNEL_OK")
</pallas_src>

<mosaic_0001>
module attributes {stable_mosaic.version = 11 : i64} {
  func.func @_enc_attn_kernel(%arg0: i32, %arg1: i32, %arg2: memref<128x8xf32, #tpu.memory_space<vmem>>, %arg3: memref<128x12xf32, #tpu.memory_space<vmem>>, %arg4: memref<128x128xf32, #tpu.memory_space<vmem>>, %arg5: memref<128x128xf32, #tpu.memory_space<vmem>>, %arg6: memref<8x32xf32, #tpu.memory_space<vmem>>, %arg7: memref<12x32xf32, #tpu.memory_space<vmem>>, %arg8: memref<32x32xf32, #tpu.memory_space<vmem>>, %arg9: memref<1x32xf32, #tpu.memory_space<vmem>>, %arg10: memref<128x512xf32, #tpu.memory_space<vmem>>, %arg11: memref<128x8xf32, #tpu.memory_space<vmem>>, %arg12: memref<128x12xf32, #tpu.memory_space<vmem>>) attributes {dimension_semantics = [#tpu.dimension_semantics<parallel>, #tpu.dimension_semantics<arbitrary>], iteration_bounds = array<i64: 3, 3>, scalar_prefetch = 0 : i64, scratch_operands = 2 : i64, tpu.core_type = #tpu.core_type<tc>, window_params = [{transform_indices = @transform_0, window_bounds = array<i64: 128, 8>}, {transform_indices = @transform_1, window_bounds = array<i64: 128, 12>}, {transform_indices = @transform_2, window_bounds = array<i64: 128, 128>}, {transform_indices = @transform_3, window_bounds = array<i64: 128, 128>}, {pipeline_mode = #tpu.pipeline_mode<synchronous>, transform_indices = @transform_4, window_bounds = array<i64: 8, 32>}, {pipeline_mode = #tpu.pipeline_mode<synchronous>, transform_indices = @transform_5, window_bounds = array<i64: 12, 32>}, {pipeline_mode = #tpu.pipeline_mode<synchronous>, transform_indices = @transform_6, window_bounds = array<i64: 32, 32>}, {pipeline_mode = #tpu.pipeline_mode<synchronous>, transform_indices = @transform_7, window_bounds = array<i64: 1, 32>}, {transform_indices = @transform_8, window_bounds = array<i64: 128, 512>}]} {
    %c0_i32 = arith.constant 0 : i32
    %0 = arith.cmpi eq, %arg1, %c0_i32 : i32
    %1 = arith.extui %0 : i1 to i32
    %c0_i32_0 = arith.constant 0 : i32
    %2 = arith.cmpi ne, %1, %c0_i32_0 : i32
    scf.if %2 {
      %cst_18 = arith.constant 0.000000e+00 : f32
      %18 = vector.broadcast %cst_18 : f32 to vector<128x8xf32>
      %c0_19 = arith.constant 0 : index
      %c0_20 = arith.constant 0 : index
      %19 = vector.load %arg11[%c0_19, %c0_20] : memref<128x8xf32, #tpu.memory_space<vmem>>, vector<128x8xf32>
      tpu.vector_store %arg11[%c0_19, %c0_20], %18 {strides = array<i32>} : memref<128x8xf32, #tpu.memory_space<vmem>>, vector<128x8xf32>,
      %cst_21 = arith.constant 0.000000e+00 : f32
      %20 = vector.broadcast %cst_21 : f32 to vector<128x12xf32>
      %c0_22 = arith.constant 0 : index
      %c0_23 = arith.constant 0 : index
      %21 = vector.load %arg12[%c0_22, %c0_23] : memref<128x12xf32, #tpu.memory_space<vmem>>, vector<128x12xf32>
      tpu.vector_store %arg12[%c0_22, %c0_23], %20 {strides = array<i32>} : memref<128x12xf32, #tpu.memory_space<vmem>>, vector<128x12xf32>,
    } else {
    }
    %c0 = arith.constant 0 : index
    %c0_1 = arith.constant 0 : index
    %3 = vector.load %arg2[%c0, %c0_1] : memref<128x8xf32, #tpu.memory_space<vmem>>, vector<128x8xf32>
    %c0_2 = arith.constant 0 : index
    %c0_3 = arith.constant 0 : index
    %4 = vector.load %arg11[%c0_2, %c0_3] : memref<128x8xf32, #tpu.memory_space<vmem>>, vector<128x8xf32>
    %c0_4 = arith.constant 0 : index
    %c0_5 = arith.constant 0 : index
    %5 = vector.load %arg4[%c0_4, %c0_5] : memref<128x128xf32, #tpu.memory_space<vmem>>, vector<128x128xf32>
    %cst = arith.constant dense<0.000000e+00> : vector<128x8xf32>
    %6 = tpu.matmul %5, %3, %cst {dimension_numbers = #tpu.dot_dimension_numbers<[1], [0], [0], [1], [0, 0, 1, 1], [], []>} : vector<128x128xf32>, vector<128x8xf32>, vector<128x8xf32> -> vector<128x8xf32>
    %7 = arith.addf %4, %6 : vector<128x8xf32>
    %c0_6 = arith.constant 0 : index
    %c0_7 = arith.constant 0 : index
    %8 = vector.load %arg11[%c0_6, %c0_7] : memref<128x8xf32, #tpu.memory_space<vmem>>, vector<128x8xf32>
    tpu.vector_store %arg11[%c0_6, %c0_7], %7 {strides = array<i32>} : memref<128x8xf32, #tpu.memory_space<vmem>>, vector<128x8xf32>,
    %c0_8 = arith.constant 0 : index
    %c0_9 = arith.constant 0 : index
    %9 = vector.load %arg3[%c0_8, %c0_9] : memref<128x12xf32, #tpu.memory_space<vmem>>, vector<128x12xf32>
    %c0_10 = arith.constant 0 : index
    %c0_11 = arith.constant 0 : index
    %10 = vector.load %arg12[%c0_10, %c0_11] : memref<128x12xf32, #tpu.memory_space<vmem>>, vector<128x12xf32>
    %c0_12 = arith.constant 0 : index
    %c0_13 = arith.constant 0 : index
    %11 = vector.load %arg5[%c0_12, %c0_13] : memref<128x128xf32, #tpu.memory_space<vmem>>, vector<128x128xf32>
    %cst_14 = arith.constant dense<0.000000e+00> : vector<128x12xf32>
    %12 = tpu.matmul %11, %9, %cst_14 {dimension_numbers = #tpu.dot_dimension_numbers<[1], [0], [0], [1], [0, 0, 1, 1], [], []>} : vector<128x128xf32>, vector<128x12xf32>, vector<128x12xf32> -> vector<128x12xf32>
    %13 = arith.addf %10, %12 : vector<128x12xf32>
    %c0_15 = arith.constant 0 : index
    %c0_16 = arith.constant 0 : index
    %14 = vector.load %arg12[%c0_15, %c0_16] : memref<128x12xf32, #tpu.memory_space<vmem>>, vector<128x12xf32>
    tpu.vector_store %arg12[%c0_15, %c0_16], %13 {strides = array<i32>} : memref<128x12xf32, #tpu.memory_space<vmem>>, vector<128x12xf32>,
    %c2_i32 = arith.constant 2 : i32
    %15 = arith.cmpi eq, %arg1, %c2_i32 : i32
    %16 = arith.extui %15 : i1 to i32
    %c0_i32_17 = arith.constant 0 : i32
    %17 = arith.cmpi ne, %16, %c0_i32_17 : i32
    scf.if %17 {
      %c0_18 = arith.constant 0 : index
      %c0_19 = arith.constant 0 : index
      %18 = vector.load %arg11[%c0_18, %c0_19] : memref<128x8xf32, #tpu.memory_space<vmem>>, vector<128x8xf32>
      %c0_20 = arith.constant 0 : index
      %c0_21 = arith.constant 0 : index
      %19 = vector.load %arg6[%c0_20, %c0_21] : memref<8x32xf32, #tpu.memory_space<vmem>>, vector<8x32xf32>
      %cst_22 = arith.constant dense<0.000000e+00> : vector<128x32xf32>
      %20 = tpu.matmul %18, %19, %cst_22 {dimension_numbers = #tpu.dot_dimension_numbers<[1], [0], [0], [1], [0, 0, 1, 1], [], []>} : vector<128x8xf32>, vector<8x32xf32>, vector<128x32xf32> -> vector<128x32xf32>
      %c0_23 = arith.constant 0 : index
      %c0_24 = arith.constant 0 : index
      %21 = vector.load %arg10[%c0_23, %c0_24] : memref<128x512xf32, #tpu.memory_space<vmem>>, vector<128x32xf32>
      tpu.vector_store %arg10[%c0_23, %c0_24], %20 {strides = array<i32>} : memref<128x512xf32, #tpu.memory_space<vmem>>, vector<128x32xf32>,
      %c0_25 = arith.constant 0 : index
      %c0_26 = arith.constant 0 : index
      %22 = vector.load %arg8[%c0_25, %c0_26] : memref<32x32xf32, #tpu.memory_space<vmem>>, vector<32x32xf32>
      %cst_27 = arith.constant dense<0.000000e+00> : vector<128x32xf32>
      %23 = tpu.matmul %20, %22, %cst_27 {dimension_numbers = #tpu.dot_dimension_numbers<[1], [0], [0], [1], [0, 0, 1, 1], [], []>} : vector<128x32xf32>, vector<32x32xf32>, vector<128x32xf32> -> vector<128x32xf32>
      %24 = math.tanh %23 : vector<128x32xf32>
      %c0_28 = arith.constant 0 : index
      %c0_29 = arith.constant 0 : index
      %25 = vector.load %arg9[%c0_28, %c0_29] : memref<1x32xf32, #tpu.memory_space<vmem>>, vector<1x32xf32>
      %26 = vector.broadcast %25 : vector<1x32xf32> to vector<128x32xf32>
      %27 = arith.mulf %24, %26 : vector<128x32xf32>
      %cst_30 = arith.constant dense<0.000000e+00> : vector<128xf32>
      %28 = vector.multi_reduction <add>, %27, %cst_30 [1] : vector<128x32xf32> to vector<128xf32>
      %29 = vector.shape_cast %28 : vector<128xf32> to vector<128x1xf32>
      %c0_31 = arith.constant 0 : index
      %c0_32 = arith.constant 0 : index
      %30 = vector.load %arg12[%c0_31, %c0_32] : memref<128x12xf32, #tpu.memory_space<vmem>>, vector<128x12xf32>
      %c0_33 = arith.constant 0 : index
      %c0_34 = arith.constant 0 : index
      %31 = vector.load %arg7[%c0_33, %c0_34] : memref<12x32xf32, #tpu.memory_space<vmem>>, vector<12x32xf32>
      %cst_35 = arith.constant dense<0.000000e+00> : vector<128x32xf32>
      %32 = tpu.matmul %30, %31, %cst_35 {dimension_numbers = #tpu.dot_dimension_numbers<[1], [0], [0], [1], [0, 0, 1, 1], [], []>} : vector<128x12xf32>, vector<12x32xf32>, vector<128x32xf32> -> vector<128x32xf32>
      %c0_36 = arith.constant 0 : index
      %c128 = arith.constant 128 : index
      %33 = vector.load %arg10[%c0_36, %c128] : memref<128x512xf32, #tpu.memory_space<vmem>>, vector<128x32xf32>
      tpu.vector_store %arg10[%c0_36, %c128], %32 {strides = array<i32>} : memref<128x512xf32, #tpu.memory_space<vmem>>, vector<128x32xf32>,
      %c0_37 = arith.constant 0 : index
      %c0_38 = arith.constant 0 : index
      %34 = vector.load %arg8[%c0_37, %c0_38] : memref<32x32xf32, #tpu.memory_space<vmem>>, vector<32x32xf32>
      %cst_39 = arith.constant dense<0.000000e+00> : vector<128x32xf32>
      %35 = tpu.matmul %32, %34, %cst_39 {dimension_numbers = #tpu.dot_dimension_numbers<[1], [0], [0], [1], [0, 0, 1, 1], [], []>} : vector<128x32xf32>, vector<32x32xf32>, vector<128x32xf32> -> vector<128x32xf32>
      %36 = math.tanh %35 : vector<128x32xf32>
      %c0_40 = arith.constant 0 : index
      %c0_41 = arith.constant 0 : index
      %37 = vector.load %arg9[%c0_40, %c0_41] : memref<1x32xf32, #tpu.memory_space<vmem>>, vector<1x32xf32>
      %38 = vector.broadcast %37 : vector<1x32xf32> to vector<128x32xf32>
      %39 = arith.mulf %36, %38 : vector<128x32xf32>
      %cst_42 = arith.constant dense<0.000000e+00> : vector<128xf32>
      %40 = vector.multi_reduction <add>, %39, %cst_42 [1] : vector<128x32xf32> to vector<128xf32>
      %41 = vector.shape_cast %40 : vector<128xf32> to vector<128x1xf32>
      %42 = tpu.concatenate %29, %41 in 1 : vector<128x1xf32>, vector<128x1xf32> -> vector<128x2xf32>
      %cst_43 = arith.constant dense<0xFF800000> : vector<128xf32>
      %43 = vector.multi_reduction <maximumf>, %42, %cst_43 [1] : vector<128x2xf32> to vector<128xf32>
      %44 = vector.shape_cast %43 : vector<128xf32> to vector<128x1xf32>
      %45 = vector.broadcast %44 : vector<128x1xf32> to vector<128x2xf32>
      %46 = arith.subf %42, %45 : vector<128x2xf32>
      %47 = math.exp %46 : vector<128x2xf32>
      %cst_44 = arith.constant dense<0.000000e+00> : vector<128xf32>
      %48 = vector.multi_reduction <add>, %47, %cst_44 [1] : vector<128x2xf32> to vector<128xf32>
      %49 = vector.shape_cast %48 : vector<128xf32> to vector<128x1xf32>
      %50 = vector.broadcast %49 : vector<128x1xf32> to vector<128x2xf32>
      %51 = arith.divf %47, %50 : vector<128x2xf32>
      %c0_45 = arith.constant 0 : index
      %c384 = arith.constant 384 : index
      %52 = vector.load %arg10[%c0_45, %c384] : memref<128x512xf32, #tpu.memory_space<vmem>>, vector<128x2xf32>
      tpu.vector_store %arg10[%c0_45, %c384], %51 {strides = array<i32>} : memref<128x512xf32, #tpu.memory_space<vmem>>, vector<128x2xf32>,
      %cst_46 = arith.constant 0.000000e+00 : f32
      %53 = vector.broadcast %cst_46 : f32 to vector<128x32xf32>
      %c0_47 = arith.constant 0 : index
      %c0_48 = arith.constant 0 : index
      %54 = vector.load %arg10[%c0_47, %c0_48] : memref<128x512xf32, #tpu.memory_space<vmem>>, vector<128x32xf32>
      %55 = vector.extract_strided_slice %51 {offsets = [0, 0], sizes = [128, 1], strides = [1, 1]} : vector<128x2xf32> to vector<128x1xf32>
      %56 = vector.broadcast %55 : vector<128x1xf32> to vector<128x32xf32>
      %57 = arith.mulf %54, %56 : vector<128x32xf32>
      %58 = arith.addf %53, %57 : vector<128x32xf32>
      %c0_49 = arith.constant 0 : index
      %c128_50 = arith.constant 128 : index
      %59 = vector.load %arg10[%c0_49, %c128_50] : memref<128x512xf32, #tpu.memory_space<vmem>>, vector<128x32xf32>
      %60 = vector.extract_strided_slice %51 {offsets = [0, 1], sizes = [128, 1], strides = [1, 1]} : vector<128x2xf32> to vector<128x1xf32>
      %61 = vector.broadcast %60 : vector<128x1xf32> to vector<128x32xf32>
      %62 = arith.mulf %59, %61 : vector<128x32xf32>
      %63 = arith.addf %58, %62 : vector<128x32xf32>
      %c0_51 = arith.constant 0 : index
      %c256 = arith.constant 256 : index
      %64 = vector.load %arg10[%c0_51, %c256] : memref<128x512xf32, #tpu.memory_space<vmem>>, vector<128x32xf32>
      tpu.vector_store %arg10[%c0_51, %c256], %63 {strides = array<i32>} : memref<128x512xf32, #tpu.memory_space<vmem>>, vector<128x32xf32>,
    } else {
    }
    return
  }
  func.func @transform_0(%arg0: i32, %arg1: i32) -> (i32, i32) {
    %c0_i32 = arith.constant 0 : i32
    %c0_i32_0 = arith.constant 0 : i32
    return %arg1, %c0_i32 : i32, i32
  }
  func.func @transform_1(%arg0: i32, %arg1: i32) -> (i32, i32) {
    %c0_i32 = arith.constant 0 : i32
    %c0_i32_0 = arith.constant 0 : i32
    return %arg1, %c0_i32 : i32, i32
  }
  func.func @transform_2(%arg0: i32, %arg1: i32) -> (i32, i32) {
    %c0_i32 = arith.constant 0 : i32
    return %arg0, %arg1 : i32, i32
  }
  func.func @transform_3(%arg0: i32, %arg1: i32) -> (i32, i32) {
    %c0_i32 = arith.constant 0 : i32
    return %arg0, %arg1 : i32, i32
  }
  func.func @transform_4(%arg0: i32, %arg1: i32) -> (i32, i32) {
    %c0_i32 = arith.constant 0 : i32
    %c0_i32_0 = arith.constant 0 : i32
    %c0_i32_1 = arith.constant 0 : i32
    return %c0_i32, %c0_i32_0 : i32, i32
  }
  func.func @transform_5(%arg0: i32, %arg1: i32) -> (i32, i32) {
    %c0_i32 = arith.constant 0 : i32
    %c0_i32_0 = arith.constant 0 : i32
    %c0_i32_1 = arith.constant 0 : i32
    return %c0_i32, %c0_i32_0 : i32, i32
  }
  func.func @transform_6(%arg0: i32, %arg1: i32) -> (i32, i32) {
    %c0_i32 = arith.constant 0 : i32
    %c0_i32_0 = arith.constant 0 : i32
    %c0_i32_1 = arith.constant 0 : i32
    return %c0_i32, %c0_i32_0 : i32, i32
  }
  func.func @transform_7(%arg0: i32, %arg1: i32) -> (i32, i32) {
    %c0_i32 = arith.constant 0 : i32
    %c0_i32_0 = arith.constant 0 : i32
    %c0_i32_1 = arith.constant 0 : i32
    return %c0_i32, %c0_i32_0 : i32, i32
  }
  func.func @transform_8(%arg0: i32, %arg1: i32) -> (i32, i32) {
    %c0_i32 = arith.constant 0 : i32
    %c0_i32_0 = arith.constant 0 : i32
    return %arg0, %c0_i32 : i32, i32
  }
}

</mosaic_0001>

<bundles_post_ra>
// kernel: tpu_custom_call.1
= control target key start
LH: loop header
LB: loop body
LE: loop exit
PB: predicated region body
PF: predicated region fallthrough
CT: control target
= control target key end

     0   :  { %s3801_s0 = inlined_call_operand.vmem [shape: f32[384,8], index: 0, kind: input, shape index: {}]   ;;  %s3802_s1 = inlined_call_operand.vmem [shape: f32[384,12], index: 1, kind: input, shape index: {}]   ;;  %s3803_s2 = inlined_call_operand.hbm [shape: f32[384,384], index: 2, kind: input, shape index: {}]   ;;  %s3804_s3 = inlined_call_operand.hbm [shape: f32[384,384], index: 3, kind: input, shape index: {}]   ;;  %s3805_s4 = inlined_call_operand.vmem [shape: f32[8,32], index: 4, kind: input, shape index: {}]   ;;  %s3806_s5 = inlined_call_operand.vmem [shape: f32[12,32], index: 5, kind: input, shape index: {}]   ;;  %s3807_s6 = inlined_call_operand.vmem [shape: f32[32,32], index: 6, kind: input, shape index: {}]   ;;  %s3808_s7 = inlined_call_operand.vmem [shape: f32[1,32], index: 7, kind: input, shape index: {}]   ;;  %s3809_s8 = inlined_call_operand.hbm [shape: f32[384,512], index: 8, kind: output, shape index: {}]  }
   0x1   :  { %3819 = sst [smem:[#allocation24_spill]] %s3803_s2 }
   0x2   :  { %3820 = sst [smem:[#allocation25_spill]] %s3809_s8 }
   0x3   :  { %13 = vsyncpa [#allocation5], 0 }
   0x4   :  { %15 = vsyncpa [#allocation5 + $0x1], 0 }
   0x5   :  { %16 = vsyncpa [#allocation8], 0 }
   0x6   :  { %18 = vsyncpa [#allocation8 + $0x1], 0 }
   0x7   :  { %19 = vsyncpa [#allocation6], 0 }
   0x8   :  { %21 = vsyncpa [#allocation6 + $0x1], 0  ;;  %s2939_s27 = smov 0   ;;  %s2941_s28 = smov 0  }
   0x9   :  { %s2943_s29 = smov 0   ;;  %s2945_s30 = smov 0  }
   0xa   :  { %s2947_s9 = smov 0   ;;  %s2949_s10 = smov 0  }
   0xb   :  { %s2951_s11 = smov 0   ;;  %s2953_s12 = smov 0  }
   0xc   :  { %s2955_s13 = smov 0   ;;  %s2957_s14 = smov 0  }
   0xd   :  { %s2959_s15 = smov 0  }
   0xe LB: > { %3821 = sst [smem:[#allocation13_spill]] %s2844_s27  ;;  %s2295_s16 = sadd.s32 4294967295, %s2884_s15   ;;  %s2884_s15 = sphi %s2959_s15, %s27_s15   ;;  %s2880_s14 = sphi %s2957_s14, %s3858_s14   ;;  %s2876_s13 = sphi %s2955_s13, %s3857_s13   ;;  %s2872_s12 = sphi %s2953_s12, %s3848_s12   ;;  %s2868_s11 = sphi %s2951_s11, %s3856_s11   ;;  %s2864_s10 = sphi %s2949_s10, %s3846_s10   ;;  %s2860_s9 = sphi %s2947_s9, %s3855_s9   ;;  %s2856_s30 = sphi %s2945_s30, %s3854_s30   ;;  %s2852_s29 = sphi %s2943_s29, %s3853_s29   ;;  %s2848_s28 = sphi %s2941_s28, %s3852_s28   ;;  %s2844_s27 = sphi %s2939_s27, %s3851_s27  }
   0xf   : > { %3822 = sst [smem:[#allocation14_spill]] %s2852_s29  ;;  %s2296_s17 = sadd.s32 4294967294, %s2884_s15  }
  0x10   : > { %3823 = sst [smem:[#allocation15_spill]] %s2864_s10  ;;  %s36_s18 = sadd.s32 1, %s2876_s13 }
  0x11   : > { %3824 = sst [smem:[#allocation16_spill]] %s2872_s12  ;;  %s39_s19 = sadd.s32 1, %s2880_s14 }
  0x12   : > { %3825 = sst [smem:[#allocation17_spill]] %s2876_s13  ;;  %p37_p0 = scmp.ge.s32.totalorder %s36_s18, 3 }
  0x13   : > { %3826 = sst [smem:[#allocation18_spill]] %s2880_s14  ;;  %s100_s20 = sadd.s32 1, %s2864_s10 }
  0x14   : > { %p107_p1 = scmp.ne.s32.totalorder %s2864_s10, %s2860_s9  ;;  %p108_p2 = scmp.eq.s32.totalorder %s2884_s15, 0 }
  0x15   : > { %s3860_s18 = smov (%p37_p0, %s36_s18), 0  ;;  %s3862_s19 = smov (!%p37_p0, %s39_s19), %s2880_s14 }
  0x16   : > { %3827 = sst [smem:[#allocation19_spill]] %s3860_s18  ;;  %s96_s21 = ssub.s32 %s2876_s13, %s3860_s18 }
  0x17   : > { %p3005_p3 = por %p108_p2, %p107_p1  ;;  %p41_p4 = scmp.ge.s32.totalorder %s3862_s19, 3 }
  0x18   : > { %p113_p5 = scmp.ne.s32.totalorder %s2860_s9, %s2856_s30  ;;  %p114_p6 = scmp.eq.s32.totalorder %s2295_s16, 0 }
  0x19   : > { %s238_s23 = sadd.s32 1, %s2852_s29  ;;  %s3864_s19 = smov (%p41_p4, %s3862_s19), 0 }
  0x1a   : > { %3829 = sst [smem:[#allocation20_spill]] %s3864_s19  ;;  %p3013_p7 = por %p114_p6, %p113_p5 }
  0x1b   : > { %p248_p8 = scmp.ne.s32.totalorder %s2852_s29, %s2848_s28  ;;  %s95_s25 = ssub.s32 %s2880_s14, %s3864_s19 }
  0x1c   : > { %p249_p9 = scmp.eq.s32.totalorder %s2295_s16, 8  ;;  %s97_s26 = sor.u32 %s96_s21, %s95_s25 }
  0x1d   : > { %p236_p10 = scmp.eq.s32.totalorder %s95_s25, 0  ;;  %p98_p11 = scmp.eq.s32.totalorder %s97_s26, 0 }
  0x1e   : > { %p3021_p12 = por %p249_p9, %p248_p8  ;;  %p254_p13 = scmp.ne.s32.totalorder %s2848_s28, %s2844_s27 }
  0x1f   : > { %s3026_s18 = scalar_select %p236_p10, %s2852_s29, %s238_s23  }
  0x20   : > { %s3029_s8 = scalar_select %p98_p11, %s2864_s10, %s100_s20  }
  0x21   : > { %3832 = sst [smem:[#allocation21_spill]] %s3026_s18  ;;  %p255_p0 = scmp.eq.s32.totalorder %s2296_s17, 8 }
  0x22   : > { %3833 = sst [smem:[#allocation22_spill]] %s3029_s8  ;;  %p2441_p1 = scmp.lt.s32.totalorder %s2884_s15, 9 }
  0x23   : > { %p3034_p2 = por %p255_p0, %p254_p13  ;;  %s3039_s16 = sand.u32 1, %s2864_s10  }
  0x24   : > { %s2299_s21 = sshll.u32 %s3039_s16, 7  ;;  %s2422_s25 = smul.u32 48, %s2880_s14 }
  0x25   : > { %s3834_s12 = scalar_select %p3034_p2, 1, 0 }
  0x26   : > { %s309_s26 = scalar_lea.vmem [#allocation4], %s2299_s21  ;;  %p3045_p4 = pnand %p2441_p1, %p3005_p3 }
  0x27   : > { %3835 = sst [smem:[#allocation23_spill]] %s3834_s12  ;;  %s319_s23 = sshll.u32 %s309_s26, 4  ;;  %s320_s23 = int_to_ptr.vmem [resolvable:$true] %s319_s23 }
  0x28   : > { %s314_s17 = sadd.s32 %s2876_s13, %s2422_s25  ;;  %s3837_s2 = sld [smem:[#allocation24_spill]] }
  0x29   : > { %s2302_s19 = sshll.u32 %s314_s17, 3  ;;  %s306_s14 = scalar_lea.sflag [#allocation5], %s3039_s16 }
  0x2a   : > { %s2886_s12 = smov 384   ;;  %s2887_s26 = smov 128  }
  0x2b   : > { %s2888_s22 = smov 8   ;;  %p2307_p3 = scmp.ge.s32.totalorder %s2884_s15, 1 }
  0x2c   : > { %p351_p5 = scmp.lt.s32.totalorder %s2884_s15, 10  ;;  %s340_s17 = scalar_lea.hbm %s3804_s3, %s2302_s19 }
  0x2d   : > { %s341_s27 = sshll.u32 %s340_s17, 4  ;;  %s333_s8 = scalar_lea.vmem [#allocation7], %s2299_s21  ;;  %s342_s27 = int_to_ptr.hbm [resolvable:$true] %s341_s27 }
  0x2e   : > { %s316_s18 = scalar_lea.hbm %s3837_s2, %s2302_s19  ;;  %p352_p6 = pnand %p2307_p3, %p351_p5 }
  0x2f   : > { %s317_s29 = sshll.u32 %s316_s18, 4  ;;  %s343_s10 = sshll.u32 %s333_s8, 4  ;;  %s318_s29 = int_to_ptr.hbm [resolvable:$true] %s317_s29  ;;  %s344_s10 = int_to_ptr.vmem [resolvable:$true] %s343_s10 }
  0x30   : > { %2433 = dma.hbm_to_vmem [thread:$0]  (!%p3045_p4), %s318_s29, 2048, %s320_s23, %s306_s14, %s2886_s12, %s2887_s26, %s2888_s22  }
  0x31   : > { %s330_s18 = scalar_lea.sflag [#allocation8], %s3039_s16  ;;  %355 = sbr.rel (%p352_p6) target bundleno = 1253 (0x4e5), region = 52 }
  0x32   : > { %2436 = dma.hbm_to_vmem [thread:$0]  (!%p3045_p4), %s342_s27, 2048, %s344_s10, %s330_s18, %s2886_s12, %s2887_s26, %s2888_s22  }
  0x33   : > { %s357_s2 = sand.u32 (!%p352_p6), 1, %s2860_s9  }
  0x34   : > { %s2308_s29 = sshll.u32 (!%p352_p6), %s357_s2, 7  ;;  %s358_s14 = scalar_lea.sflag (!%p352_p6), [#allocation5], %s357_s2 }
  0x35   : > { %s3065_s23 = scalar_lea.vmem (!%p352_p6), [#allocation4], %s2308_s29 }
  0x36   : > { %2831 = dma.done.wait (%p3013_p7), %s358_s14, 2048  }
  0x37   : > { %2833 = vsyncadd (%p3013_p7), %s358_s14, 4294965248  ;;  %s368_s13 = scalar_lea.sflag [#allocation8], %s357_s2  ;;  %s3071_s19 = scalar_lea.vmem [#allocation7], %s2308_s29 }
  0x38   : > { %2835 = dma.done.wait (%p3013_p7), %s368_s13, 2048  }
  0x39   : > { %2837 = vsyncadd (%p3013_p7), %s368_s13, 4294965248  ;;  %s417_s27 = sand.u32 1, %s2848_s28   ;;  %s2311_s12 = sshll.u32 %s2868_s11, 4 }
  0x3a   : > { %s2310_s16 = sshll.u32 %s417_s27, 9  ;;  %p421_p8 = scmp.lt.s32.totalorder %s2311_s12, 47 }
  0x3b   : > { %s3091_s17 = scalar_lea.vmem [#allocation9], %s2310_s16  ;;  %p2315_p7 = scmp.ne.s32.totalorder %s2868_s11, 0 }
  0x3c   : > { %s3866_s12 = smov (!%p421_p8, %s2311_s12), 47 }
  0x3d   : > { %s2312_s21 = sshll.u32 %s3866_s12, 3  ;;  %438 = sbr.rel (%p2315_p7) target bundleno = 99 (0x63), region = 64 }
  0x3e   : > { %s3084_s2 = scalar_lea.vmem %s3801_s0, %s2312_s21  ;;  %s3089_s24 = scalar_lea.vmem %s3802_s1, %s2312_s21 }
  0x42   : > { %vm439_vm0 = vcmask 64512   ;;  %v2889_v0 = vmov 0.0   ;;  %vm456_vm1 = vcmask 97280  }
  0x43   : > { %440 = vst.msk [vmem:[#allocation2] sm:$0xff] %vm439_vm0, %v2889_v0 }
  0x44   : > { %441 = vst.msk [vmem:[#allocation2 + $0x8] sm:$0xff] %vm439_vm0, %v2889_v0 }
  0x45   : > { %442 = vst.msk [vmem:[#allocation2 + $0x10] sm:$0xff] %vm439_vm0, %v2889_v0 }
  0x46   : > { %443 = vst.msk [vmem:[#allocation2 + $0x18] sm:$0xff] %vm439_vm0, %v2889_v0 }
  0x47   : > { %444 = vst.msk [vmem:[#allocation2 + $0x20] sm:$0xff] %vm439_vm0, %v2889_v0 }
  0x48   : > { %445 = vst.msk [vmem:[#allocation2 + $0x28] sm:$0xff] %vm439_vm0, %v2889_v0 }
  0x49   : > { %446 = vst.msk [vmem:[#allocation2 + $0x30] sm:$0xff] %vm439_vm0, %v2889_v0 }
  0x4a   : > { %447 = vst.msk [vmem:[#allocation2 + $0x38] sm:$0xff] %vm439_vm0, %v2889_v0 }
  0x4b   : > { %448 = vst.msk [vmem:[#allocation2 + $0x40] sm:$0xff] %vm439_vm0, %v2889_v0 }
  0x4c   : > { %449 = vst.msk [vmem:[#allocation2 + $0x48] sm:$0xff] %vm439_vm0, %v2889_v0 }
  0x4d   : > { %450 = vst.msk [vmem:[#allocation2 + $0x50] sm:$0xff] %vm439_vm0, %v2889_v0 }
  0x4e   : > { %451 = vst.msk [vmem:[#allocation2 + $0x58] sm:$0xff] %vm439_vm0, %v2889_v0 }
  0x4f   : > { %452 = vst.msk [vmem:[#allocation2 + $0x60] sm:$0xff] %vm439_vm0, %v2889_v0 }
  0x50   : > { %453 = vst.msk [vmem:[#allocation2 + $0x68] sm:$0xff] %vm439_vm0, %v2889_v0 }
  0x51   : > { %454 = vst.msk [vmem:[#allocation2 + $0x70] sm:$0xff] %vm439_vm0, %v2889_v0 }
  0x52   : > { %455 = vst.msk [vmem:[#allocation2 + $0x78] sm:$0xff] %vm439_vm0, %v2889_v0 }
  0x53   : > { %457 = vst.msk [vmem:[#allocation3] sm:$0xff] %vm456_vm1, %v2889_v0 }
  0x54   : > { %458 = vst.msk [vmem:[#allocation3 + $0x8] sm:$0xff] %vm456_vm1, %v2889_v0 }
  0x55   : > { %459 = vst.msk [vmem:[#allocation3 + $0x10] sm:$0xff] %vm456_vm1, %v2889_v0 }
  0x56   : > { %460 = vst.msk [vmem:[#allocation3 + $0x18] sm:$0xff] %vm456_vm1, %v2889_v0 }
  0x57   : > { %461 = vst.msk [vmem:[#allocation3 + $0x20] sm:$0xff] %vm456_vm1, %v2889_v0 }
  0x58   : > { %462 = vst.msk [vmem:[#allocation3 + $0x28] sm:$0xff] %vm456_vm1, %v2889_v0 }
  0x59   : > { %463 = vst.msk [vmem:[#allocation3 + $0x30] sm:$0xff] %vm456_vm1, %v2889_v0 }
  0x5a   : > { %464 = vst.msk [vmem:[#allocation3 + $0x38] sm:$0xff] %vm456_vm1, %v2889_v0 }
  0x5b   : > { %465 = vst.msk [vmem:[#allocation3 + $0x40] sm:$0xff] %vm456_vm1, %v2889_v0 }
  0x5c   : > { %466 = vst.msk [vmem:[#allocation3 + $0x48] sm:$0xff] %vm456_vm1, %v2889_v0 }
  0x5d   : > { %467 = vst.msk [vmem:[#allocation3 + $0x50] sm:$0xff] %vm456_vm1, %v2889_v0 }
  0x5e   : > { %468 = vst.msk [vmem:[#allocation3 + $0x58] sm:$0xff] %vm456_vm1, %v2889_v0 }
  0x5f   : > { %469 = vst.msk [vmem:[#allocation3 + $0x60] sm:$0xff] %vm456_vm1, %v2889_v0 }
  0x60   : > { %470 = vst.msk [vmem:[#allocation3 + $0x68] sm:$0xff] %vm456_vm1, %v2889_v0 }
  0x61   : > { %471 = vst.msk [vmem:[#allocation3 + $0x70] sm:$0xff] %vm456_vm1, %v2889_v0 }
  0x62   : > { %472 = vst.msk [vmem:[#allocation3 + $0x78] sm:$0xff] %vm456_vm1, %v2889_v0 }
  0x63 PF: > { %v488_v1 = vld [vmem:[%s3084_s2 + $0x78] sm:$0xff]  ;;  %v487_v3 = vld [vmem:[%s3084_s2 + $0x70] sm:$0xff]  ;;  %v486_v5 = vld [vmem:[%s3084_s2 + $0x68] sm:$0xff]  ;;  %vm602_vm2 = vcmask 64512   ;;  %vm748_vm3 = vcmask 97280   ;;  %p2316_p9 = scmp.ne.s32.totalorder %s2868_s11, 2 }
  0x64   : > { %v634_v2 = vld [vmem:[%s3089_s24 + $0x78] sm:$0xff]  ;;  %2390 = vmatpush.msra.mxu2 %v488_v1  ;;  %v633_v4 = vld [vmem:[%s3089_s24 + $0x70] sm:$0xff]  ;;  %v632_v6 = vld [vmem:[%s3089_s24 + $0x68] sm:$0xff]  ;;  %521 = vmatpush.msra.mxu0 %v488_v1 }
  0x65   : > { %2406 = vmatpush.msra.mxu3 %v634_v2  ;;  %667 = vmatpush.msra.mxu1 %v634_v2  ;;  %v485_v7 = vld [vmem:[%s3084_s2 + $0x60] sm:$0xff]  ;;  %v484_v9 = vld [vmem:[%s3084_s2 + $0x58] sm:$0xff]  ;;  %v483_v11 = vld [vmem:[%s3084_s2 + $0x50] sm:$0xff] }
  0x66   : > { %2391 = vmatpush.msra.mxu2 %v487_v3  ;;  %v631_v8 = vld [vmem:[%s3089_s24 + $0x60] sm:$0xff]  ;;  %522 = vmatpush.msra.mxu0 %v487_v3  ;;  %v630_v10 = vld [vmem:[%s3089_s24 + $0x58] sm:$0xff]  ;;  %v629_v12 = vld [vmem:[%s3089_s24 + $0x50] sm:$0xff] }
  0x67   : > { %2407 = vmatpush.msra.mxu3 %v633_v4  ;;  %668 = vmatpush.msra.mxu1 %v633_v4  ;;  %v482_v13 = vld [vmem:[%s3084_s2 + $0x48] sm:$0xff]  ;;  %v481_v15 = vld [vmem:[%s3084_s2 + $0x40] sm:$0xff]  ;;  %v480_v17 = vld [vmem:[%s3084_s2 + $0x38] sm:$0xff] }
  0x68   : > { %2392 = vmatpush.msra.mxu2 %v486_v5  ;;  %523 = vmatpush.msra.mxu0 %v486_v5  ;;  %v628_v14 = vld [vmem:[%s3089_s24 + $0x48] sm:$0xff]  ;;  %v627_v16 = vld [vmem:[%s3089_s24 + $0x40] sm:$0xff]  ;;  %v626_v18 = vld [vmem:[%s3089_s24 + $0x38] sm:$0xff] }
  0x69   : > { %2408 = vmatpush.msra.mxu3 %v632_v6  ;;  %669 = vmatpush.msra.mxu1 %v632_v6  ;;  %v479_v19 = vld [vmem:[%s3084_s2 + $0x30] sm:$0xff]  ;;  %v478_v21 = vld [vmem:[%s3084_s2 + $0x28] sm:$0xff]  ;;  %v477_v23 = vld [vmem:[%s3084_s2 + $0x20] sm:$0xff] }
  0x6a   : > { %2393 = vmatpush.msra.mxu2 %v485_v7  ;;  %524 = vmatpush.msra.mxu0 %v485_v7  ;;  %v625_v20 = vld [vmem:[%s3089_s24 + $0x30] sm:$0xff]  ;;  %v624_v22 = vld [vmem:[%s3089_s24 + $0x28] sm:$0xff]  ;;  %v623_v24 = vld [vmem:[%s3089_s24 + $0x20] sm:$0xff] }
  0x6b   : > { %2409 = vmatpush.msra.mxu3 %v631_v8  ;;  %670 = vmatpush.msra.mxu1 %v631_v8  ;;  %v476_v25 = vld [vmem:[%s3084_s2 + $0x18] sm:$0xff]  ;;  %v475_v27 = vld [vmem:[%s3084_s2 + $0x10] sm:$0xff]  ;;  %v474_v29 = vld [vmem:[%s3084_s2 + $0x8] sm:$0xff] }
  0x6c   : > { %2394 = vmatpush.msra.mxu2 %v484_v9  ;;  %525 = vmatpush.msra.mxu0 %v484_v9  ;;  %v622_v26 = vld [vmem:[%s3089_s24 + $0x18] sm:$0xff]  ;;  %v621_v28 = vld [vmem:[%s3089_s24 + $0x10] sm:$0xff]  ;;  %v620_v30 = vld [vmem:[%s3089_s24 + $0x8] sm:$0xff] }
  0x6d   : > { %2410 = vmatpush.msra.mxu3 %v630_v10  ;;  %671 = vmatpush.msra.mxu1 %v630_v10  ;;  %v473_v31 = vld [vmem:[%s3084_s2] sm:$0xff]  ;;  %v514_v37 = vld [vmem:[%s3065_s23 + $0x48] sm:$0xff]  ;;  %v515_v41 = vld [vmem:[%s3065_s23 + $0x50] sm:$0xff] }
  0x6e   : > { %2395 = vmatpush.msra.mxu2 %v483_v11  ;;  %526 = vmatpush.msra.mxu0 %v483_v11  ;;  %v619_v32 = vld [vmem:[%s3089_s24] sm:$0xff]  ;;  %v660_v38 = vld [vmem:[%s3071_s19 + $0x48] sm:$0xff]  ;;  %v661_v42 = vld [vmem:[%s3071_s19 + $0x50] sm:$0xff] }
  0x6f   : > { %2411 = vmatpush.msra.mxu3 %v629_v12  ;;  %672 = vmatpush.msra.mxu1 %v629_v12  ;;  %v513_v33 = vld [vmem:[%s3065_s23 + $0x40] sm:$0xff]  ;;  %v506_v39 = vld [vmem:[%s3065_s23 + $0x8] sm:$0xff]  ;;  %v507_v43 = vld [vmem:[%s3065_s23 + $0x10] sm:$0xff] }
  0x70   : > { %2396 = vmatpush.msra.mxu2 %v482_v13  ;;  %527 = vmatpush.msra.mxu0 %v482_v13  ;;  %v659_v34 = vld [vmem:[%s3071_s19 + $0x40] sm:$0xff]  ;;  %v652_v40 = vld [vmem:[%s3071_s19 + $0x8] sm:$0xff]  ;;  %v653_v44 = vld [vmem:[%s3071_s19 + $0x10] sm:$0xff] }
  0x71   : > { %2412 = vmatpush.msra.mxu3 %v628_v14  ;;  %673 = vmatpush.msra.mxu1 %v628_v14  ;;  %v505_v35 = vld [vmem:[%s3065_s23] sm:$0xff]  ;;  %v516_v45 = vld [vmem:[%s3065_s23 + $0x58] sm:$0xff]  ;;  %v518_v53 = vld [vmem:[%s3065_s23 + $0x68] sm:$0xff] }
  0x72   : > { %2397 = vmatpush.msra.mxu2 %v481_v15  ;;  %528 = vmatpush.msra.mxu0 %v481_v15  ;;  %v651_v36 = vld [vmem:[%s3071_s19] sm:$0xff]  ;;  %v662_v46 = vld [vmem:[%s3071_s19 + $0x58] sm:$0xff]  ;;  %v664_v54 = vld [vmem:[%s3071_s19 + $0x68] sm:$0xff] }
  0x73   : > { %2413 = vmatpush.msra.mxu3 %v627_v16  ;;  %674 = vmatpush.msra.mxu1 %v627_v16  ;;  %v508_v47 = vld [vmem:[%s3065_s23 + $0x18] sm:$0xff]  ;;  %v517_v49 = vld [vmem:[%s3065_s23 + $0x60] sm:$0xff]  ;;  %v510_v55 = vld [vmem:[%s3065_s23 + $0x28] sm:$0xff] }
  0x74   : > { %2398 = vmatpush.msra.mxu2 %v480_v17  ;;  %529 = vmatpush.msra.mxu0 %v480_v17  ;;  %v654_v48 = vld [vmem:[%s3071_s19 + $0x18] sm:$0xff]  ;;  %v663_v50 = vld [vmem:[%s3071_s19 + $0x60] sm:$0xff]  ;;  %v656_v56 = vld [vmem:[%s3071_s19 + $0x28] sm:$0xff] }
  0x75   : > { %2414 = vmatpush.msra.mxu3 %v626_v18  ;;  %675 = vmatpush.msra.mxu1 %v626_v18  ;;  %v509_v51 = vld [vmem:[%s3065_s23 + $0x20] sm:$0xff]  ;;  %v519_v57 = vld [vmem:[%s3065_s23 + $0x70] sm:$0xff]  ;;  %v520_v61 = vld [vmem:[%s3065_s23 + $0x78] sm:$0xff] }
  0x76   : > { %2399 = vmatpush.msra.mxu2 %v479_v19  ;;  %530 = vmatpush.msra.mxu0 %v479_v19  ;;  %v655_v52 = vld [vmem:[%s3071_s19 + $0x20] sm:$0xff]  ;;  %v665_v58 = vld [vmem:[%s3071_s19 + $0x70] sm:$0xff]  ;;  %v666_v62 = vld [vmem:[%s3071_s19 + $0x78] sm:$0xff] }
  0x77   : > { %2415 = vmatpush.msra.mxu3 %v625_v20  ;;  %676 = vmatpush.msra.mxu1 %v625_v20  ;;  %v511_v59 = vld [vmem:[%s3065_s23 + $0x30] sm:$0xff]  ;;  %v512_v63 = vld [vmem:[%s3065_s23 + $0x38] sm:$0xff]  ;;  %v489_v1 = vld [vmem:[#allocation2] sm:$0xff] }
  0x78   : > { %2400 = vmatpush.msra.mxu2 %v478_v21  ;;  %531 = vmatpush.msra.mxu0 %v478_v21  ;;  %v657_v60 = vld [vmem:[%s3071_s19 + $0x30] sm:$0xff]  ;;  %v658_v0 = vld [vmem:[%s3071_s19 + $0x38] sm:$0xff]  ;;  %v635_v2 = vld [vmem:[#allocation3] sm:$0xff] }
  0x79   : > { %2416 = vmatpush.msra.mxu3 %v624_v22  ;;  %677 = vmatpush.msra.mxu1 %v624_v22  ;;  %v497_v7 = vld [vmem:[#allocation2 + $0x40] sm:$0xff]  ;;  %v490_v13 = vld [vmem:[#allocation2 + $0x8] sm:$0xff] }
  0x7a   : > { %2401 = vmatpush.msra.mxu2 %v477_v23  ;;  %532 = vmatpush.msra.mxu0 %v477_v23  ;;  %v643_v8 = vld [vmem:[#allocation3 + $0x40] sm:$0xff]  ;;  %v636_v14 = vld [vmem:[#allocation3 + $0x8] sm:$0xff] }
  0x7b   : > { %2417 = vmatpush.msra.mxu3 %v623_v24  ;;  %678 = vmatpush.msra.mxu1 %v623_v24  ;;  %v498_v19 = vld [vmem:[#allocation2 + $0x48] sm:$0xff] }
  0x7c   : > { %2402 = vmatpush.msra.mxu2 %v476_v25  ;;  %533 = vmatpush.msra.mxu0 %v476_v25  ;;  %v644_v20 = vld [vmem:[#allocation3 + $0x48] sm:$0xff]  ;;  %v491_v25 = vld [vmem:[#allocation2 + $0x10] sm:$0xff] }
  0x7d   : > { %2418 = vmatpush.msra.mxu3 %v622_v26  ;;  %679 = vmatpush.msra.mxu1 %v622_v26  ;;  %v637_v26 = vld [vmem:[#allocation3 + $0x10] sm:$0xff] }
  0x7e   : > { %2403 = vmatpush.msra.mxu2 %v475_v27  ;;  %534 = vmatpush.msra.mxu0 %v475_v27 }
  0x7f   : > { %2419 = vmatpush.msra.mxu3 %v621_v28  ;;  %680 = vmatpush.msra.mxu1 %v621_v28 }
  0x80   : > { %2404 = vmatpush.msra.mxu2 %v474_v29  ;;  %535 = vmatpush.msra.mxu0 %v474_v29 }
  0x81   : > { %2420 = vmatpush.msra.mxu3 %v620_v30  ;;  %681 = vmatpush.msra.mxu1 %v620_v30 }
  0x82   : > { %2405 = vmatpush.msra.mxu2 %v473_v31  ;;  %536 = vmatpush.msra.mxu0 %v473_v31  ;;  %v499_v31 = vld [vmem:[#allocation2 + $0x50] sm:$0xff] }
  0x83   : > { %2421 = vmatpush.msra.mxu3 %v619_v32  ;;  %561 = vmatmul.f32.vlgmr.msra.gmra.mxu2 %v513_v33 }
  0x84   : > { %707 = vmatmul.f32.vlgmr.msra.gmra.mxu3 %v659_v34  ;;  %682 = vmatpush.msra.mxu1 %v619_v32  ;;  %v645_v32 = vld [vmem:[#allocation3 + $0x50] sm:$0xff] }
  0x85   : > { %537 = vmatmul.f32.vlgmr.msra.gmra.mxu0 %v505_v35  ;;  %683 = vmatmul.f32.vlgmr.msra.gmra.mxu1 %v651_v36 }
  0x8b   : > { %564 = vmatmul.f32.gmra.mxu2 %v514_v37  ;;  %v492_v37 = vld [vmem:[#allocation2 + $0x18] sm:$0xff] }
  0x8c   : > { %710 = vmatmul.f32.gmra.mxu3 %v660_v38  ;;  %v638_v38 = vld [vmem:[#allocation3 + $0x18] sm:$0xff] }
  0x8d   : > { %540 = vmatmul.f32.gmra.mxu0 %v506_v39  ;;  %686 = vmatmul.f32.gmra.mxu1 %v652_v40 }
  0x93   : > { %567 = vmatmul.f32.gmra.mxu2 %v515_v41 }
  0x94   : > { %713 = vmatmul.f32.gmra.mxu3 %v661_v42 }
  0x95   : > { %543 = vmatmul.f32.gmra.mxu0 %v507_v43  ;;  %689 = vmatmul.f32.gmra.mxu1 %v653_v44  ;;  %v500_v43 = vld [vmem:[#allocation2 + $0x58] sm:$0xff] }
  0x96   : > { %v646_v44 = vld [vmem:[#allocation3 + $0x58] sm:$0xff] }
  0x9b   : > { %570 = vmatmul.f32.gmra.mxu2 %v516_v45 }
  0x9c   : > { %716 = vmatmul.f32.gmra.mxu3 %v662_v46 }
  0x9d   : > { %546 = vmatmul.f32.gmra.mxu0 %v508_v47  ;;  %692 = vmatmul.f32.gmra.mxu1 %v654_v48 }
  0xa3   : > { %573 = vmatmul.f32.gmra.mxu2 %v517_v49  ;;  %v493_v49 = vld [vmem:[#allocation2 + $0x20] sm:$0xff] }
  0xa4   : > { %719 = vmatmul.f32.gmra.mxu3 %v663_v50  ;;  %v639_v50 = vld [vmem:[#allocation3 + $0x20] sm:$0xff] }
  0xa5   : > { %549 = vmatmul.f32.gmra.mxu0 %v509_v51  ;;  %695 = vmatmul.f32.gmra.mxu1 %v655_v52 }
  0xab   : > { %576 = vmatmul.f32.gmra.mxu2 %v518_v53 }
  0xac   : > { %722 = vmatmul.f32.gmra.mxu3 %v664_v54 }
  0xad   : > { %552 = vmatmul.f32.gmra.mxu0 %v510_v55  ;;  %698 = vmatmul.f32.gmra.mxu1 %v656_v56  ;;  %v501_v55 = vld [vmem:[#allocation2 + $0x60] sm:$0xff] }
  0xae   : > { %v647_v56 = vld [vmem:[#allocation3 + $0x60] sm:$0xff] }
  0xb3   : > { %579 = vmatmul.f32.gmra.mxu2 %v519_v57 }
  0xb4   : > { %725 = vmatmul.f32.gmra.mxu3 %v665_v58 }
  0xb5   : > { %555 = vmatmul.f32.gmra.mxu0 %v511_v59  ;;  %701 = vmatmul.f32.gmra.mxu1 %v657_v60 }
  0xbb   : > { %582 = vmatmul.f32.gmra.mxu2 %v520_v61  ;;  %v494_v61 = vld [vmem:[#allocation2 + $0x28] sm:$0xff] }
  0xbc   : > { %728 = vmatmul.f32.gmra.mxu3 %v666_v62  ;;  %v640_v62 = vld [vmem:[#allocation3 + $0x28] sm:$0xff] }
  0xbd   : > { %558 = vmatmul.f32.gmra.mxu0 %v512_v63  ;;  %704 = vmatmul.f32.gmra.mxu1 %v658_v0 }
 0x102   : > { %v538_v3 = vpop.f32.mrf.mxu0  ;;  %v684_v4 = vpop.f32.mrf.mxu1 }
 0x103   : > { %v586_v5 = vadd.f32 %v538_v3, %v489_v1  ;;  %v732_v6 = vadd.f32 %v684_v4, %v635_v2  ;;  %v502_v3 = vld [vmem:[#allocation2 + $0x68] sm:$0xff] }
 0x104   : > { %v648_v4 = vld [vmem:[#allocation3 + $0x68] sm:$0xff] }
 0x105   : > { %603 = vst.msk [vmem:[#allocation2] sm:$0xff] %vm602_vm2, %v586_v5 }
 0x106   : > { %v562_v9 = vpop.f32.mrf.mxu2  ;;  %749 = vst.msk [vmem:[#allocation3] sm:$0xff] %vm748_vm3, %v732_v6 }
 0x107   : > { %v708_v10 = vpop.f32.mrf.mxu3  ;;  %v594_v11 = vadd.f32 %v562_v9, %v497_v7  ;;  %v495_v9 = vld [vmem:[#allocation2 + $0x30] sm:$0xff] }
 0x108   : > { %v740_v12 = vadd.f32 %v708_v10, %v643_v8  ;;  %v641_v10 = vld [vmem:[#allocation3 + $0x30] sm:$0xff] }
 0x109   : > { %611 = vst.msk [vmem:[#allocation2 + $0x40] sm:$0xff] %vm602_vm2, %v594_v11 }
 0x10a   : > { %757 = vst.msk [vmem:[#allocation3 + $0x40] sm:$0xff] %vm748_vm3, %v740_v12  ;;  %v541_v15 = vpop.f32.mrf.mxu0  ;;  %v687_v16 = vpop.f32.mrf.mxu1 }
 0x10b   : > { %v587_v17 = vadd.f32 %v541_v15, %v490_v13  ;;  %v733_v18 = vadd.f32 %v687_v16, %v636_v14  ;;  %v503_v15 = vld [vmem:[#allocation2 + $0x70] sm:$0xff] }
 0x10c   : > { %v649_v16 = vld [vmem:[#allocation3 + $0x70] sm:$0xff] }
 0x10d   : > { %604 = vst.msk [vmem:[#allocation2 + $0x8] sm:$0xff] %vm602_vm2, %v587_v17 }
 0x10e   : > { %v565_v21 = vpop.f32.mrf.mxu2  ;;  %750 = vst.msk [vmem:[#allocation3 + $0x8] sm:$0xff] %vm748_vm3, %v733_v18 }
 0x10f   : > { %v711_v22 = vpop.f32.mrf.mxu3  ;;  %v595_v23 = vadd.f32 %v565_v21, %v498_v19  ;;  %v496_v21 = vld [vmem:[#allocation2 + $0x38] sm:$0xff] }
 0x110   : > { %v741_v24 = vadd.f32 %v711_v22, %v644_v20  ;;  %v642_v22 = vld [vmem:[#allocation3 + $0x38] sm:$0xff] }
 0x111   : > { %612 = vst.msk [vmem:[#allocation2 + $0x48] sm:$0xff] %vm602_vm2, %v595_v23 }
 0x112   : > { %758 = vst.msk [vmem:[#allocation3 + $0x48] sm:$0xff] %vm748_vm3, %v741_v24  ;;  %v544_v27 = vpop.f32.mrf.mxu0  ;;  %v690_v28 = vpop.f32.mrf.mxu1 }
 0x113   : > { %v588_v29 = vadd.f32 %v544_v27, %v491_v25  ;;  %v734_v30 = vadd.f32 %v690_v28, %v637_v26  ;;  %v504_v27 = vld [vmem:[#allocation2 + $0x78] sm:$0xff] }
 0x114   : > { %v650_v28 = vld [vmem:[#allocation3 + $0x78] sm:$0xff] }
 0x115   : > { %605 = vst.msk [vmem:[#allocation2 + $0x10] sm:$0xff] %vm602_vm2, %v588_v29 }
 0x116   : > { %v568_v33 = vpop.f32.mrf.mxu2  ;;  %751 = vst.msk [vmem:[#allocation3 + $0x10] sm:$0xff] %vm748_vm3, %v734_v30 }
 0x117   : > { %v714_v34 = vpop.f32.mrf.mxu3  ;;  %v596_v35 = vadd.f32 %v568_v33, %v499_v31 }
 0x118   : > { %v742_v36 = vadd.f32 %v714_v34, %v645_v32 }
 0x119   : > { %613 = vst.msk [vmem:[#allocation2 + $0x50] sm:$0xff] %vm602_vm2, %v596_v35 }
 0x11a   : > { %759 = vst.msk [vmem:[#allocation3 + $0x50] sm:$0xff] %vm748_vm3, %v742_v36  ;;  %v547_v39 = vpop.f32.mrf.mxu0  ;;  %v693_v40 = vpop.f32.mrf.mxu1 }
 0x11b   : > { %v589_v41 = vadd.f32 %v547_v39, %v492_v37  ;;  %v735_v42 = vadd.f32 %v693_v40, %v638_v38 }
 0x11d   : > { %606 = vst.msk [vmem:[#allocation2 + $0x18] sm:$0xff] %vm602_vm2, %v589_v41 }
 0x11e   : > { %v571_v45 = vpop.f32.mrf.mxu2  ;;  %752 = vst.msk [vmem:[#allocation3 + $0x18] sm:$0xff] %vm748_vm3, %v735_v42 }
 0x11f   : > { %v717_v46 = vpop.f32.mrf.mxu3  ;;  %v597_v47 = vadd.f32 %v571_v45, %v500_v43 }
 0x120   : > { %v743_v48 = vadd.f32 %v717_v46, %v646_v44 }
 0x121   : > { %614 = vst.msk [vmem:[#allocation2 + $0x58] sm:$0xff] %vm602_vm2, %v597_v47 }
 0x122   : > { %760 = vst.msk [vmem:[#allocation3 + $0x58] sm:$0xff] %vm748_vm3, %v743_v48  ;;  %v550_v51 = vpop.f32.mrf.mxu0  ;;  %v696_v52 = vpop.f32.mrf.mxu1 }
 0x123   : > { %v590_v53 = vadd.f32 %v550_v51, %v493_v49  ;;  %v736_v54 = vadd.f32 %v696_v52, %v639_v50 }
 0x125   : > { %607 = vst.msk [vmem:[#allocation2 + $0x20] sm:$0xff] %vm602_vm2, %v590_v53 }
 0x126   : > { %v574_v57 = vpop.f32.mrf.mxu2  ;;  %753 = vst.msk [vmem:[#allocation3 + $0x20] sm:$0xff] %vm748_vm3, %v736_v54 }
 0x127   : > { %v720_v58 = vpop.f32.mrf.mxu3  ;;  %v598_v59 = vadd.f32 %v574_v57, %v501_v55 }
 0x128   : > { %v744_v60 = vadd.f32 %v720_v58, %v647_v56 }
 0x129   : > { %615 = vst.msk [vmem:[#allocation2 + $0x60] sm:$0xff] %vm602_vm2, %v598_v59 }
 0x12a   : > { %761 = vst.msk [vmem:[#allocation3 + $0x60] sm:$0xff] %vm748_vm3, %v744_v60  ;;  %v553_v63 = vpop.f32.mrf.mxu0  ;;  %v699_v0 = vpop.f32.mrf.mxu1 }
 0x12b   : > { %v591_v1 = vadd.f32 %v553_v63, %v494_v61  ;;  %v737_v2 = vadd.f32 %v699_v0, %v640_v62 }
 0x12d   : > { %608 = vst.msk [vmem:[#allocation2 + $0x28] sm:$0xff] %vm602_vm2, %v591_v1 }
 0x12e   : > { %v577_v5 = vpop.f32.mrf.mxu2  ;;  %754 = vst.msk [vmem:[#allocation3 + $0x28] sm:$0xff] %vm748_vm3, %v737_v2 }
 0x12f   : > { %v723_v6 = vpop.f32.mrf.mxu3  ;;  %v599_v7 = vadd.f32 %v577_v5, %v502_v3 }
 0x130   : > { %v745_v8 = vadd.f32 %v723_v6, %v648_v4 }
 0x131   : > { %616 = vst.msk [vmem:[#allocation2 + $0x68] sm:$0xff] %vm602_vm2, %v599_v7 }
 0x132   : > { %762 = vst.msk [vmem:[#allocation3 + $0x68] sm:$0xff] %vm748_vm3, %v745_v8  ;;  %v556_v11 = vpop.f32.mrf.mxu0  ;;  %v702_v12 = vpop.f32.mrf.mxu1 }
 0x133   : > { %v592_v13 = vadd.f32 %v556_v11, %v495_v9  ;;  %v738_v14 = vadd.f32 %v702_v12, %v641_v10 }
 0x135   : > { %609 = vst.msk [vmem:[#allocation2 + $0x30] sm:$0xff] %vm602_vm2, %v592_v13 }
 0x136   : > { %v580_v17 = vpop.f32.mrf.mxu2  ;;  %755 = vst.msk [vmem:[#allocation3 + $0x30] sm:$0xff] %vm748_vm3, %v738_v14 }
 0x137   : > { %v726_v18 = vpop.f32.mrf.mxu3  ;;  %v600_v19 = vadd.f32 %v580_v17, %v503_v15 }
 0x138   : > { %v746_v20 = vadd.f32 %v726_v18, %v649_v16 }
 0x139   : > { %617 = vst.msk [vmem:[#allocation2 + $0x70] sm:$0xff] %vm602_vm2, %v600_v19 }
 0x13a   : > { %763 = vst.msk [vmem:[#allocation3 + $0x70] sm:$0xff] %vm748_vm3, %v746_v20  ;;  %v559_v23 = vpop.f32.mrf.mxu0  ;;  %v705_v24 = vpop.f32.mrf.mxu1 }
 0x13b   : > { %v593_v25 = vadd.f32 %v559_v23, %v496_v21  ;;  %v739_v26 = vadd.f32 %v705_v24, %v642_v22 }
 0x13d   : > { %610 = vst.msk [vmem:[#allocation2 + $0x38] sm:$0xff] %vm602_vm2, %v593_v25 }
 0x13e   : > { %v583_v29 = vpop.f32.mrf.mxu2  ;;  %756 = vst.msk [vmem:[#allocation3 + $0x38] sm:$0xff] %vm748_vm3, %v739_v26  ;;  %768 = sbr.rel (%p2316_p9) target bundleno = 1231 (0x4cf), region = 68 }
 0x13f   : > { %v729_v30 = vpop.f32.mrf.mxu3  ;;  %v601_v31 = vadd.f32 %v583_v29, %v504_v27 }
 0x140   : > { %v747_v32 = vadd.f32 %v729_v30, %v650_v28 }
 0x141   : > { %618 = vst.msk [vmem:[#allocation2 + $0x78] sm:$0xff] %vm602_vm2, %v601_v31 }
 0x142   : > { %764 = vst.msk [vmem:[#allocation3 + $0x78] sm:$0xff] %vm748_vm3, %v747_v32 }
 0x143   : > { %v785_v33 = vld [vmem:[%s3805_s4] sm:$0xff]  ;;  %v1134_v34 = vld [vmem:[%s3806_s5 + $0x8] sm:$0xf]  ;;  %vm1183_vm4 = vcmask 1043456   ;;  %v771_v40 = vld [vmem:[#allocation2 + $0x10] sm:$0xff]  ;;  %vm899_vm5 = vcmask 261120  }
 0x144   : > { %v769_v35 = vld [vmem:[#allocation2] sm:$0xff]  ;;  %849 = vmatpush.msra.mxu0 %v785_v33  ;;  %2349 = vmatpush.msk.msra.mxu2 %vm1183_vm4, %v1134_v34  ;;  %v770_v38 = vld [vmem:[#allocation2 + $0x8] sm:$0xff]  ;;  %v1119_v41 = vld [vmem:[#allocation3 + $0x10] sm:$0xff]  ;;  %vm1469_vm6 = vcmask 7168   ;;  %vm1486_vm7 = vcmask 15360  }
 0x145   : > { %v1133_v36 = vld [vmem:[%s3806_s5] sm:$0xff]  ;;  %2317 = vmatmul.msk.f32.vlgmr.msra.gmra.mxu0 %vm602_vm2, %v769_v35  ;;  %v1118_v39 = vld [vmem:[#allocation3 + $0x8] sm:$0xff]  ;;  %v772_v42 = vld [vmem:[#allocation2 + $0x18] sm:$0xff] }
 0x146   : > { %v1117_v37 = vld [vmem:[#allocation3] sm:$0xff]  ;;  %1202 = vmatpush.msra.mxu2 %v1133_v36  ;;  %v1120_v43 = vld [vmem:[#allocation3 + $0x18] sm:$0xff]  ;;  %v774_v46 = vld [vmem:[#allocation2 + $0x28] sm:$0xff] }
 0x147   : > { %2350 = vmatmul.msk.f32.vlgmr.msra.gmra.mxu2 %vm748_vm3, %v1117_v37  ;;  %v773_v44 = vld [vmem:[#allocation2 + $0x20] sm:$0xff]  ;;  %v1122_v47 = vld [vmem:[#allocation3 + $0x28] sm:$0xff]  ;;  %v775_v48 = vld [vmem:[#allocation2 + $0x30] sm:$0xff] }
 0x148   : > { %v1121_v45 = vld [vmem:[#allocation3 + $0x20] sm:$0xff]  ;;  %v1123_v49 = vld [vmem:[#allocation3 + $0x30] sm:$0xff]  ;;  %v776_v50 = vld [vmem:[#allocation2 + $0x38] sm:$0xff] }
 0x149   : > { %v1124_v51 = vld [vmem:[#allocation3 + $0x38] sm:$0xff]  ;;  %v777_v52 = vld [vmem:[#allocation2 + $0x40] sm:$0xff]  ;;  %v778_v54 = vld [vmem:[#allocation2 + $0x48] sm:$0xff] }
 0x14a   : > { %v1125_v53 = vld [vmem:[#allocation3 + $0x40] sm:$0xff]  ;;  %v1126_v55 = vld [vmem:[#allocation3 + $0x48] sm:$0xff]  ;;  %v779_v56 = vld [vmem:[#allocation2 + $0x50] sm:$0xff] }
 0x14b   : > { %v1127_v57 = vld [vmem:[#allocation3 + $0x50] sm:$0xff]  ;;  %v919_v58 = vld [vmem:[%s3807_s6 + $0x18] sm:$0xff]  ;;  %v917_v62 = vld [vmem:[%s3807_s6 + $0x8] sm:$0xff] }
 0x14c   : > { %980 = vmatpush.msra.mxu1 %v919_v58  ;;  %1332 = vmatpush.msra.mxu3 %v919_v58  ;;  %v780_v59 = vld [vmem:[#allocation2 + $0x58] sm:$0xff]  ;;  %v918_v61 = vld [vmem:[%s3807_s6 + $0x10] sm:$0xff]  ;;  %v916_v63 = vld [vmem:[%s3807_s6] sm:$0xff] }
 0x14d   : > { %2318 = vmatmul.msk.f32.gmra.mxu0 %vm602_vm2, %v770_v38  ;;  %v1128_v60 = vld [vmem:[#allocation3 + $0x58] sm:$0xff]  ;;  %v781_v0 = vld [vmem:[#allocation2 + $0x60] sm:$0xff]  ;;  %v782_v2 = vld [vmem:[#allocation2 + $0x68] sm:$0xff] }
 0x14e   : > { %981 = vmatpush.msra.mxu1 %v918_v61  ;;  %1333 = vmatpush.msra.mxu3 %v918_v61  ;;  %v1129_v1 = vld [vmem:[#allocation3 + $0x60] sm:$0xff]  ;;  %v1130_v3 = vld [vmem:[#allocation3 + $0x68] sm:$0xff]  ;;  %v783_v4 = vld [vmem:[#allocation2 + $0x70] sm:$0xff] }
 0x14f   : > { %2351 = vmatmul.msk.f32.gmra.mxu2 %vm748_vm3, %v1118_v39  ;;  %v1131_v5 = vld [vmem:[#allocation3 + $0x70] sm:$0xff]  ;;  %v784_v6 = vld [vmem:[#allocation2 + $0x78] sm:$0xff] }
 0x150   : > { %982 = vmatpush.msra.mxu1 %v917_v62  ;;  %1334 = vmatpush.msra.mxu3 %v917_v62  ;;  %v1132_v7 = vld [vmem:[#allocation3 + $0x78] sm:$0xff] }
 0x152   : > { %983 = vmatpush.msra.mxu1 %v916_v63  ;;  %1335 = vmatpush.msra.mxu3 %v916_v63 }
 0x155   : > { %2319 = vmatmul.msk.f32.gmra.mxu0 %vm602_vm2, %v771_v40 }
 0x157   : > { %2352 = vmatmul.msk.f32.gmra.mxu2 %vm748_vm3, %v1119_v41  ;;  %v3375_v41 = vld [vmem:[%s3808_s7] ss:$0 sm:$0xff] }
 0x15d   : > { %2320 = vmatmul.msk.f32.gmra.mxu0 %vm602_vm2, %v772_v42 }
 0x15f   : > { %2353 = vmatmul.msk.f32.gmra.mxu2 %vm748_vm3, %v1120_v43 }
 0x165   : > { %2321 = vmatmul.msk.f32.gmra.mxu0 %vm602_vm2, %v773_v44 }
 0x167   : > { %2354 = vmatmul.msk.f32.gmra.mxu2 %vm748_vm3, %v1121_v45 }
 0x16d   : > { %2322 = vmatmul.msk.f32.gmra.mxu0 %vm602_vm2, %v774_v46 }
 0x16f   : > { %2355 = vmatmul.msk.f32.gmra.mxu2 %vm748_vm3, %v1122_v47 }
 0x175   : > { %2323 = vmatmul.msk.f32.gmra.mxu0 %vm602_vm2, %v775_v48 }
 0x177   : > { %2356 = vmatmul.msk.f32.gmra.mxu2 %vm748_vm3, %v1123_v49 }
 0x17d   : > { %2324 = vmatmul.msk.f32.gmra.mxu0 %vm602_vm2, %v776_v50  ;;  %v3383_v50 = vld [vmem:[%s3808_s7] ss:$0 sm:$0xff] }
 0x17f   : > { %2357 = vmatmul.msk.f32.gmra.mxu2 %vm748_vm3, %v1124_v51 }
 0x185   : > { %2325 = vmatmul.msk.f32.gmra.mxu0 %vm602_vm2, %v777_v52 }
 0x187   : > { %2358 = vmatmul.msk.f32.gmra.mxu2 %vm748_vm3, %v1125_v53 }
 0x18d   : > { %2326 = vmatmul.msk.f32.gmra.mxu0 %vm602_vm2, %v778_v54 }
 0x18f   : > { %2359 = vmatmul.msk.f32.gmra.mxu2 %vm748_vm3, %v1126_v55 }
 0x195   : > { %2327 = vmatmul.msk.f32.gmra.mxu0 %vm602_vm2, %v779_v56 }
 0x197   : > { %2360 = vmatmul.msk.f32.gmra.mxu2 %vm748_vm3, %v1127_v57 }
 0x19d   : > { %2328 = vmatmul.msk.f32.gmra.mxu0 %vm602_vm2, %v780_v59 }
 0x19f   : > { %2361 = vmatmul.msk.f32.gmra.mxu2 %vm748_vm3, %v1128_v60 }
 0x1a5   : > { %2329 = vmatmul.msk.f32.gmra.mxu0 %vm602_vm2, %v781_v0 }
 0x1a7   : > { %2362 = vmatmul.msk.f32.gmra.mxu2 %vm748_vm3, %v1129_v1 }
 0x1ad   : > { %2330 = vmatmul.msk.f32.gmra.mxu0 %vm602_vm2, %v782_v2 }
 0x1af   : > { %2363 = vmatmul.msk.f32.gmra.mxu2 %vm748_vm3, %v1130_v3 }
 0x1b5   : > { %2331 = vmatmul.msk.f32.gmra.mxu0 %vm602_vm2, %v783_v4 }
 0x1b7   : > { %2364 = vmatmul.msk.f32.gmra.mxu2 %vm748_vm3, %v1131_v5 }
 0x1bd   : > { %2332 = vmatmul.msk.f32.gmra.mxu0 %vm602_vm2, %v784_v6 }
 0x1bf   : > { %2365 = vmatmul.msk.f32.gmra.mxu2 %vm748_vm3, %v1132_v7 }
 0x1c2   : > { %v851_v8 = vpop.f32.mrf.mxu0 }
 0x1c3   : > { %900 = vst.msk [vmem:[%s3091_s17] sm:$0xff] %vm899_vm5, %v851_v8  ;;  %2333 = vmatmul.msk.f32.vlgmr.msra.gmra.mxu1 %vm899_vm5, %v851_v8 }
 0x1ca   : > { %v854_v9 = vpop.f32.mrf.mxu0  ;;  %v1204_v10 = vpop.f32.mrf.mxu2 }
 0x1cb   : > { %901 = vst.msk [vmem:[%s3091_s17 + $0x20] sm:$0xff] %vm899_vm5, %v854_v9  ;;  %2334 = vmatmul.msk.f32.gmra.mxu1 %vm899_vm5, %v854_v9  ;;  %2366 = vmatmul.msk.f32.vlgmr.msra.gmra.mxu3 %vm899_vm5, %v1204_v10 }
 0x1cc   : > { %1252 = vst.msk [vmem:[%s3091_s17 + $0x8] sm:$0xff] %vm899_vm5, %v1204_v10 }
 0x1d2   : > { %v857_v11 = vpop.f32.mrf.mxu0  ;;  %v1207_v12 = vpop.f32.mrf.mxu2 }
 0x1d3   : > { %902 = vst.msk [vmem:[%s3091_s17 + $0x40] sm:$0xff] %vm899_vm5, %v857_v11  ;;  %2335 = vmatmul.msk.f32.gmra.mxu1 %vm899_vm5, %v857_v11  ;;  %2367 = vmatmul.msk.f32.gmra.mxu3 %vm899_vm5, %v1207_v12 }
 0x1d4   : > { %1253 = vst.msk [vmem:[%s3091_s17 + $0x28] sm:$0xff] %vm899_vm5, %v1207_v12 }
 0x1da   : > { %v860_v13 = vpop.f32.mrf.mxu0  ;;  %v1210_v14 = vpop.f32.mrf.mxu2 }
 0x1db   : > { %903 = vst.msk [vmem:[%s3091_s17 + $0x60] sm:$0xff] %vm899_vm5, %v860_v13  ;;  %2336 = vmatmul.msk.f32.gmra.mxu1 %vm899_vm5, %v860_v13  ;;  %2368 = vmatmul.msk.f32.gmra.mxu3 %vm899_vm5, %v1210_v14 }
 0x1dc   : > { %1254 = vst.msk [vmem:[%s3091_s17 + $0x48] sm:$0xff] %vm899_vm5, %v1210_v14 }
 0x1e2   : > { %v863_v15 = vpop.f32.mrf.mxu0  ;;  %v1213_v16 = vpop.f32.mrf.mxu2 }
 0x1e3   : > { %904 = vst.msk [vmem:[%s3091_s17 + $0x80] sm:$0xff] %vm899_vm5, %v863_v15  ;;  %2337 = vmatmul.msk.f32.gmra.mxu1 %vm899_vm5, %v863_v15  ;;  %2369 = vmatmul.msk.f32.gmra.mxu3 %vm899_vm5, %v1213_v16 }
 0x1e4   : > { %1255 = vst.msk [vmem:[%s3091_s17 + $0x68] sm:$0xff] %vm899_vm5, %v1213_v16 }
 0x1ea   : > { %v866_v17 = vpop.f32.mrf.mxu0  ;;  %v1216_v18 = vpop.f32.mrf.mxu2 }
 0x1eb   : > { %905 = vst.msk [vmem:[%s3091_s17 + $0xa0] sm:$0xff] %vm899_vm5, %v866_v17  ;;  %2338 = vmatmul.msk.f32.gmra.mxu1 %vm899_vm5, %v866_v17  ;;  %2370 = vmatmul.msk.f32.gmra.mxu3 %vm899_vm5, %v1216_v18 }
 0x1ec   : > { %1256 = vst.msk [vmem:[%s3091_s17 + $0x88] sm:$0xff] %vm899_vm5, %v1216_v18 }
 0x1f2   : > { %v869_v19 = vpop.f32.mrf.mxu0  ;;  %v1219_v20 = vpop.f32.mrf.mxu2 }
 0x1f3   : > { %906 = vst.msk [vmem:[%s3091_s17 + $0xc0] sm:$0xff] %vm899_vm5, %v869_v19  ;;  %2339 = vmatmul.msk.f32.gmra.mxu1 %vm899_vm5, %v869_v19  ;;  %2371 = vmatmul.msk.f32.gmra.mxu3 %vm899_vm5, %v1219_v20 }
 0x1f4   : > { %1257 = vst.msk [vmem:[%s3091_s17 + $0xa8] sm:$0xff] %vm899_vm5, %v1219_v20 }
 0x1fa   : > { %v872_v21 = vpop.f32.mrf.mxu0  ;;  %v1222_v22 = vpop.f32.mrf.mxu2 }
 0x1fb   : > { %907 = vst.msk [vmem:[%s3091_s17 + $0xe0] sm:$0xff] %vm899_vm5, %v872_v21  ;;  %2340 = vmatmul.msk.f32.gmra.mxu1 %vm899_vm5, %v872_v21  ;;  %2372 = vmatmul.msk.f32.gmra.mxu3 %vm899_vm5, %v1222_v22 }
 0x1fc   : > { %1258 = vst.msk [vmem:[%s3091_s17 + $0xc8] sm:$0xff] %vm899_vm5, %v1222_v22 }
 0x202   : > { %v875_v23 = vpop.f32.mrf.mxu0  ;;  %v1225_v24 = vpop.f32.mrf.mxu2 }
 0x203   : > { %908 = vst.msk [vmem:[%s3091_s17 + $0x100] sm:$0xff] %vm899_vm5, %v875_v23  ;;  %2341 = vmatmul.msk.f32.gmra.mxu1 %vm899_vm5, %v875_v23  ;;  %2373 = vmatmul.msk.f32.gmra.mxu3 %vm899_vm5, %v1225_v24 }
 0x204   : > { %1259 = vst.msk [vmem:[%s3091_s17 + $0xe8] sm:$0xff] %vm899_vm5, %v1225_v24 }
 0x20a   : > { %v878_v25 = vpop.f32.mrf.mxu0  ;;  %v1228_v26 = vpop.f32.mrf.mxu2 }
 0x20b   : > { %909 = vst.msk [vmem:[%s3091_s17 + $0x120] sm:$0xff] %vm899_vm5, %v878_v25  ;;  %2342 = vmatmul.msk.f32.gmra.mxu1 %vm899_vm5, %v878_v25  ;;  %2374 = vmatmul.msk.f32.gmra.mxu3 %vm899_vm5, %v1228_v26 }
 0x20c   : > { %1260 = vst.msk [vmem:[%s3091_s17 + $0x108] sm:$0xff] %vm899_vm5, %v1228_v26 }
 0x212   : > { %v881_v27 = vpop.f32.mrf.mxu0  ;;  %v1231_v28 = vpop.f32.mrf.mxu2 }
 0x213   : > { %910 = vst.msk [vmem:[%s3091_s17 + $0x140] sm:$0xff] %vm899_vm5, %v881_v27  ;;  %2343 = vmatmul.msk.f32.gmra.mxu1 %vm899_vm5, %v881_v27  ;;  %2375 = vmatmul.msk.f32.gmra.mxu3 %vm899_vm5, %v1231_v28 }
 0x214   : > { %1261 = vst.msk [vmem:[%s3091_s17 + $0x128] sm:$0xff] %vm899_vm5, %v1231_v28 }
 0x21a   : > { %v884_v29 = vpop.f32.mrf.mxu0  ;;  %v1234_v30 = vpop.f32.mrf.mxu2 }
 0x21b   : > { %911 = vst.msk [vmem:[%s3091_s17 + $0x160] sm:$0xff] %vm899_vm5, %v884_v29  ;;  %2344 = vmatmul.msk.f32.gmra.mxu1 %vm899_vm5, %v884_v29  ;;  %2376 = vmatmul.msk.f32.gmra.mxu3 %vm899_vm5, %v1234_v30 }
 0x21c   : > { %1262 = vst.msk [vmem:[%s3091_s17 + $0x148] sm:$0xff] %vm899_vm5, %v1234_v30 }
 0x222   : > { %v887_v31 = vpop.f32.mrf.mxu0  ;;  %v1237_v32 = vpop.f32.mrf.mxu2 }
 0x223   : > { %912 = vst.msk [vmem:[%s3091_s17 + $0x180] sm:$0xff] %vm899_vm5, %v887_v31  ;;  %2345 = vmatmul.msk.f32.gmra.mxu1 %vm899_vm5, %v887_v31  ;;  %2377 = vmatmul.msk.f32.gmra.mxu3 %vm899_vm5, %v1237_v32 }
 0x224   : > { %1263 = vst.msk [vmem:[%s3091_s17 + $0x168] sm:$0xff] %vm899_vm5, %v1237_v32 }
 0x22a   : > { %v890_v33 = vpop.f32.mrf.mxu0  ;;  %v1240_v34 = vpop.f32.mrf.mxu2 }
 0x22b   : > { %913 = vst.msk [vmem:[%s3091_s17 + $0x1a0] sm:$0xff] %vm899_vm5, %v890_v33  ;;  %2346 = vmatmul.msk.f32.gmra.mxu1 %vm899_vm5, %v890_v33  ;;  %2378 = vmatmul.msk.f32.gmra.mxu3 %vm899_vm5, %v1240_v34 }
 0x22c   : > { %1264 = vst.msk [vmem:[%s3091_s17 + $0x188] sm:$0xff] %vm899_vm5, %v1240_v34 }
 0x232   : > { %v893_v35 = vpop.f32.mrf.mxu0  ;;  %v1243_v36 = vpop.f32.mrf.mxu2 }
 0x233   : > { %914 = vst.msk [vmem:[%s3091_s17 + $0x1c0] sm:$0xff] %vm899_vm5, %v893_v35  ;;  %2347 = vmatmul.msk.f32.gmra.mxu1 %vm899_vm5, %v893_v35  ;;  %2379 = vmatmul.msk.f32.gmra.mxu3 %vm899_vm5, %v1243_v36 }
 0x234   : > { %1265 = vst.msk [vmem:[%s3091_s17 + $0x1a8] sm:$0xff] %vm899_vm5, %v1243_v36 }
 0x23a   : > { %v896_v37 = vpop.f32.mrf.mxu0  ;;  %v1246_v38 = vpop.f32.mrf.mxu2 }
 0x23b   : > { %915 = vst.msk [vmem:[%s3091_s17 + $0x1e0] sm:$0xff] %vm899_vm5, %v896_v37  ;;  %2348 = vmatmul.msk.f32.gmra.mxu1 %vm899_vm5, %v896_v37  ;;  %2380 = vmatmul.msk.f32.gmra.mxu3 %vm899_vm5, %v1246_v38 }
 0x23c   : > { %1266 = vst.msk [vmem:[%s3091_s17 + $0x1c8] sm:$0xff] %vm899_vm5, %v1246_v38 }
 0x240   : > { %v985_v39 = vpop.f32.mrf.mxu1 }
 0x241   : > { %2570 = vtanh.f32 %v985_v39 }
 0x242   : > { %v1249_v40 = vpop.f32.mrf.mxu2 }
 0x243   : > { %1267 = vst.msk [vmem:[%s3091_s17 + $0x1e8] sm:$0xff] %vm899_vm5, %v1249_v40  ;;  %2381 = vmatmul.msk.f32.gmra.mxu3 %vm899_vm5, %v1249_v40 }
 0x247   : > { %v2571_v42 = vpop.eup %2570 }
 0x248   : > { %v988_v43 = vpop.f32.mrf.mxu1  ;;  %v1053_v44 = vmul.f32 %v2571_v42, %v3375_v41 }
 0x249   : > { %2572 = vtanh.f32 %v988_v43 }
 0x24a   : > { %v1069_v45 = vsel %vm899_vm5, %v1053_v44, 0.0 }
 0x24b   : > { %1070 = vadd.xlane.f32.xlu0 %v1069_v45 }
 0x24e   : > { %v1337_v46 = vpop.f32.mrf.mxu3 }
 0x24f   : > { %v2573_v47 = vpop.eup %2572  ;;  %2574 = vtanh.f32 %v1337_v46 }
 0x250   : > { %v991_v48 = vpop.f32.mrf.mxu1  ;;  %v1054_v49 = vmul.f32 %v2573_v47, %v3375_v41 }
 0x251   : > { %2576 = vtanh.f32 %v991_v48 }
 0x252   : > { %v1072_v51 = vsel %vm899_vm5, %v1054_v49, 0.0 }
 0x253   : > { %1073 = vadd.xlane.f32.xlu0 %v1072_v51 }
 0x255   : > { %v2575_v52 = vpop.eup %2574 }
 0x256   : > { %v1340_v53 = vpop.f32.mrf.mxu3  ;;  %v1405_v54 = vmul.f32 %v2575_v52, %v3383_v50 }
 0x257   : > { %v2577_v55 = vpop.eup %2576  ;;  %2578 = vtanh.f32 %v1340_v53 }
 0x258   : > { %v994_v56 = vpop.f32.mrf.mxu1  ;;  %v1421_v57 = vsel %vm899_vm5, %v1405_v54, 0.0  ;;  %v1055_v58 = vmul.f32 %v2577_v55, %v3375_v41 }
 0x259   : > { %2580 = vtanh.f32 %v994_v56  ;;  %1422 = vadd.xlane.f32.xlu1 %v1421_v57 }
 0x25a   : > { %v1075_v62 = vsel %vm899_vm5, %v1055_v58, 0.0 }
 0x25d   : > { %v2579_v59 = vpop.eup %2578 }
 0x25e   : > { %v1343_v60 = vpop.f32.mrf.mxu3  ;;  %v1406_v61 = vmul.f32 %v2579_v59, %v3383_v50 }
 0x25f   : > { %v2581_v63 = vpop.eup %2580  ;;  %2582 = vtanh.f32 %v1343_v60 }
 0x260   : > { %v997_v0 = vpop.f32.mrf.mxu1  ;;  %v1424_v1 = vsel %vm899_vm5, %v1406_v61, 0.0  ;;  %v1056_v2 = vmul.f32 %v2581_v63, %v3375_v41 }
 0x261   : > { %2584 = vtanh.f32 %v997_v0  ;;  %1425 = vadd.xlane.f32.xlu2 %v1424_v1  ;;  %1076 = vadd.xlane.f32.xlu1 %v1075_v62 }
 0x262   : > { %v1078_v6 = vsel %vm899_vm5, %v1056_v2, 0.0 }
 0x265   : > { %v2583_v3 = vpop.eup %2582 }
 0x266   : > { %v1346_v4 = vpop.f32.mrf.mxu3  ;;  %v1407_v5 = vmul.f32 %v2583_v3, %v3383_v50 }
 0x267   : > { %v2585_v7 = vpop.eup %2584  ;;  %2586 = vtanh.f32 %v1346_v4 }
 0x268   : > { %v1000_v8 = vpop.f32.mrf.mxu1  ;;  %v1427_v9 = vsel %vm899_vm5, %v1407_v5, 0.0  ;;  %v1057_v10 = vmul.f32 %v2585_v7, %v3375_v41 }
 0x269   : > { %2588 = vtanh.f32 %v1000_v8  ;;  %1428 = vadd.xlane.f32.xlu0 %v1427_v9  ;;  %1079 = vadd.xlane.f32.xlu1 %v1078_v6 }
 0x26a   : > { %v1081_v11 = vsel %vm899_vm5, %v1057_v10, 0.0 }
 0x26b   : > { %1082 = vadd.xlane.f32.xlu2 %v1081_v11 }
 0x26d   : > { %v2587_v12 = vpop.eup %2586 }
 0x26e   : > { %v1349_v13 = vpop.f32.mrf.mxu3  ;;  %v1408_v14 = vmul.f32 %v2587_v12, %v3383_v50 }
 0x26f   : > { %v2589_v15 = vpop.eup %2588  ;;  %2590 = vtanh.f32 %v1349_v13 }
 0x270   : > { %v1003_v16 = vpop.f32.mrf.mxu1  ;;  %v1430_v17 = vsel %vm899_vm5, %v1408_v14, 0.0  ;;  %v1058_v18 = vmul.f32 %v2589_v15, %v3375_v41 }
 0x271   : > { %2592 = vtanh.f32 %v1003_v16  ;;  %1431 = vadd.xlane.f32.xlu1 %v1430_v17 }
 0x272   : > { %v1084_v19 = vsel %vm899_vm5, %v1058_v18, 0.0 }
 0x273   : > { %1085 = vadd.xlane.f32.xlu2 %v1084_v19 }
 0x275   : > { %v2591_v20 = vpop.eup %2590 }
 0x276   : > { %v1352_v21 = vpop.f32.mrf.mxu3  ;;  %v1409_v22 = vmul.f32 %v2591_v20, %v3383_v50 }
 0x277   : > { %v2593_v23 = vpop.eup %2592  ;;  %2594 = vtanh.f32 %v1352_v21 }
 0x278   : > { %v1006_v24 = vpop.f32.mrf.mxu1  ;;  %v1059_v25 = vmul.f32 %v2593_v23, %v3375_v41  ;;  %v1433_v26 = vsel %vm899_vm5, %v1409_v22, 0.0 }
 0x279   : > { %2596 = vtanh.f32 %v1006_v24 }
 0x27a   : > { %v1087_v27 = vsel %vm899_vm5, %v1059_v25, 0.0 }
 0x27b   : > { %1434 = vadd.xlane.f32.xlu2 %v1433_v26  ;;  %1088 = vadd.xlane.f32.xlu0 %v1087_v27 }
 0x27d   : > { %v2595_v28 = vpop.eup %2594 }
 0x27e   : > { %v1355_v29 = vpop.f32.mrf.mxu3  ;;  %v1410_v30 = vmul.f32 %v2595_v28, %v3383_v50 }
 0x27f   : > { %v2597_v31 = vpop.eup %2596  ;;  %2598 = vtanh.f32 %v1355_v29 }
 0x280   : > { %v1009_v32 = vpop.f32.mrf.mxu1  ;;  %v1060_v33 = vmul.f32 %v2597_v31, %v3375_v41  ;;  %v1436_v34 = vsel %vm899_vm5, %v1410_v30, 0.0 }
 0x281   : > { %2600 = vtanh.f32 %v1009_v32 }
 0x282   : > { %v1090_v35 = vsel %vm899_vm5, %v1060_v33, 0.0 }
 0x283   : > { %1437 = vadd.xlane.f32.xlu0 %v1436_v34  ;;  %1091 = vadd.xlane.f32.xlu1 %v1090_v35 }
 0x285   : > { %v2599_v36 = vpop.eup %2598 }
 0x286   : > { %v1358_v37 = vpop.f32.mrf.mxu3  ;;  %v1411_v38 = vmul.f32 %v2599_v36, %v3383_v50 }
 0x287   : > { %v2601_v39 = vpop.eup %2600  ;;  %2602 = vtanh.f32 %v1358_v37 }
 0x288   : > { %v1012_v40 = vpop.f32.mrf.mxu1  ;;  %v1061_v42 = vmul.f32 %v2601_v39, %v3375_v41  ;;  %v1439_v43 = vsel %vm899_vm5, %v1411_v38, 0.0 }
 0x289   : > { %2604 = vtanh.f32 %v1012_v40 }
 0x28a   : > { %v1093_v44 = vsel %vm899_vm5, %v1061_v42, 0.0 }
 0x28b   : > { %1440 = vadd.xlane.f32.xlu1 %v1439_v43  ;;  %1094 = vadd.xlane.f32.xlu2 %v1093_v44 }
 0x28d   : > { %v2603_v45 = vpop.eup %2602 }
 0x28e   : > { %v1361_v46 = vpop.f32.mrf.mxu3  ;;  %v1412_v47 = vmul.f32 %v2603_v45, %v3383_v50 }
 0x28f   : > { %v2605_v48 = vpop.eup %2604  ;;  %2606 = vtanh.f32 %v1361_v46 }
 0x290   : > { %v1015_v49 = vpop.f32.mrf.mxu1  ;;  %v1062_v51 = vmul.f32 %v2605_v48, %v3375_v41  ;;  %v1442_v52 = vsel %vm899_vm5, %v1412_v47, 0.0 }
 0x291   : > { %2608 = vtanh.f32 %v1015_v49 }
 0x292   : > { %v1096_v53 = vsel %vm899_vm5, %v1062_v51, 0.0 }
 0x293   : > { %1443 = vadd.xlane.f32.xlu2 %v1442_v52  ;;  %1097 = vadd.xlane.f32.xlu0 %v1096_v53 }
 0x295   : > { %v2607_v54 = vpop.eup %2606 }
 0x296   : > { %v1364_v55 = vpop.f32.mrf.mxu3  ;;  %v1413_v56 = vmul.f32 %v2607_v54, %v3383_v50 }
 0x297   : > { %v2609_v57 = vpop.eup %2608  ;;  %2610 = vtanh.f32 %v1364_v55 }
 0x298   : > { %v1018_v58 = vpop.f32.mrf.mxu1  ;;  %v1063_v59 = vmul.f32 %v2609_v57, %v3375_v41  ;;  %v1445_v60 = vsel %vm899_vm5, %v1413_v56, 0.0 }
 0x299   : > { %2612 = vtanh.f32 %v1018_v58 }
 0x29a   : > { %v1099_v61 = vsel %vm899_vm5, %v1063_v59, 0.0 }
 0x29b   : > { %1446 = vadd.xlane.f32.xlu0 %v1445_v60  ;;  %1100 = vadd.xlane.f32.xlu1 %v1099_v61 }
 0x29d   : > { %v2611_v62 = vpop.eup %2610 }
 0x29e   : > { %v1367_v63 = vpop.f32.mrf.mxu3  ;;  %v1414_v0 = vmul.f32 %v2611_v62, %v3383_v50 }
 0x29f   : > { %v2613_v1 = vpop.eup %2612  ;;  %2614 = vtanh.f32 %v1367_v63 }
 0x2a0   : > { %v1021_v2 = vpop.f32.mrf.mxu1  ;;  %v1064_v3 = vmul.f32 %v2613_v1, %v3375_v41  ;;  %v1448_v4 = vsel %vm899_vm5, %v1414_v0, 0.0 }
 0x2a1   : > { %2616 = vtanh.f32 %v1021_v2 }
 0x2a2   : > { %v1102_v5 = vsel %vm899_vm5, %v1064_v3, 0.0 }
 0x2a3   : > { %1449 = vadd.xlane.f32.xlu1 %v1448_v4  ;;  %1103 = vadd.xlane.f32.xlu2 %v1102_v5 }
 0x2a5   : > { %v2615_v6 = vpop.eup %2614 }
 0x2a6   : > { %v1370_v7 = vpop.f32.mrf.mxu3  ;;  %v1415_v8 = vmul.f32 %v2615_v6, %v3383_v50 }
 0x2a7   : > { %v2617_v9 = vpop.eup %2616  ;;  %2618 = vtanh.f32 %v1370_v7 }
 0x2a8   : > { %v1024_v10 = vpop.f32.mrf.mxu1  ;;  %v1065_v11 = vmul.f32 %v2617_v9, %v3375_v41  ;;  %v1451_v12 = vsel %vm899_vm5, %v1415_v8, 0.0 }
 0x2a9   : > { %2620 = vtanh.f32 %v1024_v10 }
 0x2aa   : > { %v1105_v13 = vsel %vm899_vm5, %v1065_v11, 0.0 }
 0x2ab   : > { %1452 = vadd.xlane.f32.xlu2 %v1451_v12  ;;  %1106 = vadd.xlane.f32.xlu0 %v1105_v13 }
 0x2ad   : > { %v2619_v14 = vpop.eup %2618 }
 0x2ae   : > { %v1373_v15 = vpop.f32.mrf.mxu3  ;;  %v1416_v16 = vmul.f32 %v2619_v14, %v3383_v50 }
 0x2af   : > { %v2621_v17 = vpop.eup %2620  ;;  %2622 = vtanh.f32 %v1373_v15 }
 0x2b0   : > { %v1027_v18 = vpop.f32.mrf.mxu1  ;;  %v1066_v19 = vmul.f32 %v2621_v17, %v3375_v41  ;;  %v1454_v20 = vsel %vm899_vm5, %v1416_v16, 0.0 }
 0x2b1   : > { %2624 = vtanh.f32 %v1027_v18 }
 0x2b2   : > { %v1108_v21 = vsel %vm899_vm5, %v1066_v19, 0.0 }
 0x2b3   : > { %1455 = vadd.xlane.f32.xlu0 %v1454_v20  ;;  %1109 = vadd.xlane.f32.xlu1 %v1108_v21 }
 0x2b5   : > { %v2623_v22 = vpop.eup %2622 }
 0x2b6   : > { %v1376_v23 = vpop.f32.mrf.mxu3  ;;  %v1417_v24 = vmul.f32 %v2623_v22, %v3383_v50 }
 0x2b7   : > { %v2625_v25 = vpop.eup %2624  ;;  %2626 = vtanh.f32 %v1376_v23 }
 0x2b8   : > { %v1030_v26 = vpop.f32.mrf.mxu1  ;;  %v1067_v27 = vmul.f32 %v2625_v25, %v3375_v41  ;;  %v1457_v28 = vsel %vm899_vm5, %v1417_v24, 0.0 }
 0x2b9   : > { %2628 = vtanh.f32 %v1030_v26 }
 0x2ba   : > { %v1111_v29 = vsel %vm899_vm5, %v1067_v27, 0.0 }
 0x2bb   : > { %1458 = vadd.xlane.f32.xlu1 %v1457_v28  ;;  %1112 = vadd.xlane.f32.xlu2 %v1111_v29 }
 0x2bd   : > { %v2627_v30 = vpop.eup %2626 }
 0x2be   : > { %v1379_v31 = vpop.f32.mrf.mxu3  ;;  %v1418_v32 = vmul.f32 %v2627_v30, %v3383_v50  ;;  %v1071_v40 = vpop.xlane.xlu0 %1070 }
 0x2bf   : > { %v2629_v33 = vpop.eup %2628  ;;  %2630 = vtanh.f32 %v1379_v31 }
 0x2c0   : > { %v1068_v34 = vmul.f32 %v2629_v33, %v3375_v41  ;;  %v1460_v35 = vsel %vm899_vm5, %v1418_v32, 0.0 }
 0x2c2   : > { %v1114_v36 = vsel %vm899_vm5, %v1068_v34, 0.0 }
 0x2c3   : > { %1461 = vadd.xlane.f32.xlu2 %v1460_v35  ;;  %1115 = vadd.xlane.f32.xlu0 %v1114_v36 }
 0x2c5   : > { %v2631_v37 = vpop.eup %2630 }
 0x2c6   : > { %v1382_v38 = vpop.f32.mrf.mxu3  ;;  %v1419_v39 = vmul.f32 %v2631_v37, %v3383_v50  ;;  %v1074_v48 = vpop.xlane.xlu0 %1073 }
 0x2c7   : > { %2632 = vtanh.f32 %v1382_v38 }
 0x2c8   : > { %v1463_v42 = vsel %vm899_vm5, %v1419_v39, 0.0 }
 0x2cb   : > { %1464 = vadd.xlane.f32.xlu0 %v1463_v42 }
 0x2cc   : > { %v1423_v43 = vpop.xlane.xlu1 %1422 }
 0x2cd   : > { %v2633_v44 = vpop.eup %2632  ;;  %v3445_v41 = vsel %vm1469_vm6, %v1071_v40, %v1423_v43 }
 0x2ce   : > { %v1487_v45 = vsel %vm1486_vm7, %v3445_v41, -inf  ;;  %v1420_v46 = vmul.f32 %v2633_v44, %v3383_v50 }
 0x2cf   : > { %1488 = vmax.xlane.f32.xlu2 %v1487_v45 }
 0x2d0   : > { %v1466_v47 = vsel %vm899_vm5, %v1420_v46, 0.0 }
 0x2d1   : > { %1467 = vadd.xlane.f32.xlu1 %v1466_v47 }
 0x2d4   : > { %v1426_v49 = vpop.xlane.xlu2 %1425  ;;  %v1077_v51 = vpop.xlane.xlu1 %1076 }
 0x2d5   : > { %v3452_v52 = vsel %vm1469_vm6, %v1074_v48, %v1426_v49 }
 0x2d6   : > { %v1490_v53 = vsel %vm1486_vm7, %v3452_v52, -inf }
 0x2d7   : > { %1491 = vmax.xlane.f32.xlu0 %v1490_v53 }
 0x2dc   : > { %v1429_v54 = vpop.xlane.xlu0 %1428  ;;  %v1080_v55 = vpop.xlane.xlu1 %1079 }
 0x2dd   : > { %v3457_v56 = vsel %vm1469_vm6, %v1077_v51, %v1429_v54 }
 0x2de   : > { %v1083_v50 = vpop.xlane.xlu2 %1082  ;;  %v1493_v57 = vsel %vm1486_vm7, %v3457_v56, -inf }
 0x2df   : > { %1494 = vmax.xlane.f32.xlu1 %v1493_v57 }
 0x2e4   : > { %v1432_v58 = vpop.xlane.xlu1 %1431 }
 0x2e5   : > { %v3462_v59 = vsel %vm1469_vm6, %v1080_v55, %v1432_v58 }
 0x2e6   : > { %v1086_v60 = vpop.xlane.xlu2 %1085  ;;  %v1496_v61 = vsel %vm1486_vm7, %v3462_v59, -inf }
 0x2e7   : > { %1497 = vmax.xlane.f32.xlu2 %v1496_v61 }
 0x2ee   : > { %v1435_v62 = vpop.xlane.xlu2 %1434  ;;  %v1089_v63 = vpop.xlane.xlu0 %1088 }
 0x2ef   : > { %v3467_v0 = vsel %vm1469_vm6, %v1083_v50, %v1435_v62 }
 0x2f0   : > { %v1499_v1 = vsel %vm1486_vm7, %v3467_v0, -inf }
 0x2f1   : > { %1500 = vmax.xlane.f32.xlu0 %v1499_v1 }
 0x2f6   : > { %v1438_v2 = vpop.xlane.xlu0 %1437  ;;  %v1092_v3 = vpop.xlane.xlu1 %1091 }
 0x2f7   : > { %v3472_v4 = vsel %vm1469_vm6, %v1086_v60, %v1438_v2 }
 0x2f8   : > { %v1502_v5 = vsel %vm1486_vm7, %v3472_v4, -inf }
 0x2f9   : > { %1503 = vmax.xlane.f32.xlu1 %v1502_v5 }
 0x2fe   : > { %v1441_v6 = vpop.xlane.xlu1 %1440  ;;  %v1095_v7 = vpop.xlane.xlu2 %1094 }
 0x2ff   : > { %v3477_v8 = vsel %vm1469_vm6, %v1089_v63, %v1441_v6 }
 0x300   : > { %v1505_v9 = vsel %vm1486_vm7, %v3477_v8, -inf }
 0x301   : > { %1506 = vmax.xlane.f32.xlu2 %v1505_v9 }
 0x306   : > { %v1444_v10 = vpop.xlane.xlu2 %1443  ;;  %v1098_v11 = vpop.xlane.xlu0 %1097 }
 0x307   : > { %v3482_v12 = vsel %vm1469_vm6, %v1092_v3, %v1444_v10 }
 0x308   : > { %v1508_v13 = vsel %vm1486_vm7, %v3482_v12, -inf }
 0x309   : > { %1509 = vmax.xlane.f32.xlu0 %v1508_v13 }
 0x30e   : > { %v1447_v14 = vpop.xlane.xlu0 %1446  ;;  %v1101_v15 = vpop.xlane.xlu1 %1100 }
 0x30f   : > { %v3487_v16 = vsel %vm1469_vm6, %v1095_v7, %v1447_v14 }
 0x310   : > { %v1511_v17 = vsel %vm1486_vm7, %v3487_v16, -inf }
 0x311   : > { %1512 = vmax.xlane.f32.xlu1 %v1511_v17 }
 0x316   : > { %v1450_v18 = vpop.xlane.xlu1 %1449  ;;  %v1104_v19 = vpop.xlane.xlu2 %1103 }
 0x317   : > { %v3492_v20 = vsel %vm1469_vm6, %v1098_v11, %v1450_v18 }
 0x318   : > { %v1514_v21 = vsel %vm1486_vm7, %v3492_v20, -inf }
 0x319   : > { %1515 = vmax.xlane.f32.xlu2 %v1514_v21 }
 0x31e   : > { %v1453_v22 = vpop.xlane.xlu2 %1452  ;;  %v1107_v23 = vpop.xlane.xlu0 %1106 }
 0x31f   : > { %v3497_v24 = vsel %vm1469_vm6, %v1101_v15, %v1453_v22 }
 0x320   : > { %v1517_v25 = vsel %vm1486_vm7, %v3497_v24, -inf }
 0x321   : > { %1518 = vmax.xlane.f32.xlu0 %v1517_v25 }
 0x326   : > { %v1456_v26 = vpop.xlane.xlu0 %1455  ;;  %v1110_v27 = vpop.xlane.xlu1 %1109 }
 0x327   : > { %v3502_v28 = vsel %vm1469_vm6, %v1104_v19, %v1456_v26 }
 0x328   : > { %v1520_v29 = vsel %vm1486_vm7, %v3502_v28, -inf }
 0x329   : > { %1521 = vmax.xlane.f32.xlu1 %v1520_v29 }
 0x32e   : > { %v1459_v30 = vpop.xlane.xlu1 %1458  ;;  %v1113_v31 = vpop.xlane.xlu2 %1112 }
 0x32f   : > { %v3507_v32 = vsel %vm1469_vm6, %v1107_v23, %v1459_v30 }
 0x330   : > { %v1523_v33 = vsel %vm1486_vm7, %v3507_v32, -inf }
 0x331   : > { %1524 = vmax.xlane.f32.xlu2 %v1523_v33 }
 0x336   : > { %v1462_v34 = vpop.xlane.xlu2 %1461  ;;  %v1116_v35 = vpop.xlane.xlu0 %1115 }
 0x337   : > { %v3512_v36 = vsel %vm1469_vm6, %v1110_v27, %v1462_v34 }
 0x338   : > { %v1526_v37 = vsel %vm1486_vm7, %v3512_v36, -inf }
 0x339   : > { %1527 = vmax.xlane.f32.xlu0 %v1526_v37 }
 0x33e   : > { %v1465_v38 = vpop.xlane.xlu0 %1464 }
 0x33f   : > { %v3517_v39 = vsel %vm1469_vm6, %v1113_v31, %v1465_v38 }
 0x340   : > { %v1529_v40 = vsel %vm1486_vm7, %v3517_v39, -inf }
 0x341   : > { %1530 = vmax.xlane.f32.xlu1 %v1529_v40 }
 0x342   : > { %v1489_v42 = vpop.xlane.xlu2 %1488 }
 0x343   : > { %v1535_v43 = vsub.f32 %v3445_v41, %v1489_v42 }
 0x344   : > { %v1468_v44 = vpop.xlane.xlu1 %1467 }
 0x345   : > { %v1551_v45 = vmul.f32 1.442695, %v1535_v43  ;;  %v3523_v46 = vsel %vm1469_vm6, %v1116_v35, %v1468_v44 }
 0x346   : > { %v1532_v47 = vsel %vm1486_vm7, %v3523_v46, -inf }
 0x347   : > { %2634 = vpow2.f32 %v1551_v45  ;;  %1533 = vmax.xlane.f32.xlu2 %v1532_v47 }
 0x34a   : > { %v1492_v48 = vpop.xlane.xlu0 %1491 }
 0x34b   : > { %v1536_v49 = vsub.f32 %v3452_v52, %v1492_v48 }
 0x34d   : > { %v3528_v51 = vpop.eup %2634  ;;  %v1553_v53 = vmul.f32 1.442695, %v1536_v49 }
 0x34e   : > { %v1583_v54 = vsel %vm1486_vm7, %v3528_v51, 0.0 }
 0x34f   : > { %2636 = vpow2.f32 %v1553_v53  ;;  %1584 = vadd.xlane.f32.xlu0 %v1583_v54 }
 0x352   : > { %v1495_v41 = vpop.xlane.xlu1 %1494 }
 0x353   : > { %v1537_v55 = vsub.f32 %v3457_v56, %v1495_v41 }
 0x355   : > { %v3533_v50 = vpop.eup %2636  ;;  %v1555_v57 = vmul.f32 1.442695, %v1537_v55 }
 0x356   : > { %v1586_v58 = vsel %vm1486_vm7, %v3533_v50, 0.0 }
 0x357   : > { %2638 = vpow2.f32 %v1555_v57  ;;  %1587 = vadd.xlane.f32.xlu1 %v1586_v58  ;;  %v2890_v57 = vmov 0  }
 0x358   : > { %2539 = vset.pattern.permute.xlu1 %v2890_v57  ;;  %2543 = vset.pattern.permute.xlu0 %v2890_v57 }
 0x35a   : > { %v1498_v52 = vpop.xlane.xlu2 %1497 }
 0x35b   : > { %v1538_v60 = vsub.f32 %v3462_v59, %v1498_v52 }
 0x35d   : > { %v3538_v61 = vpop.eup %2638  ;;  %v1557_v62 = vmul.f32 1.442695, %v1538_v60  ;;  %v2891_v60 = vmov 1  }
 0x35e   : > { %v1589_v63 = vsel %vm1486_vm7, %v3538_v61, 0.0  ;;  %2540 = vset.pattern.permute.xlu2 %v2891_v60 }
 0x35f   : > { %2640 = vpow2.f32 %v1557_v62  ;;  %1590 = vadd.xlane.f32.xlu2 %v1589_v63 }
 0x364   : > { %v1501_v56 = vpop.xlane.xlu0 %1500 }
 0x365   : > { %v3542_v1 = vpop.eup %2640  ;;  %v1539_v2 = vsub.f32 %v3467_v0, %v1501_v56 }
 0x366   : > { %v1592_v3 = vsel %vm1486_vm7, %v3542_v1, 0.0 }
 0x367   : > { %v1559_v5 = vmul.f32 1.442695, %v1539_v2  ;;  %1593 = vadd.xlane.f32.xlu0 %v1592_v3 }
 0x369   : > { %2642 = vpow2.f32 %v1559_v5 }
 0x36c   : > { %v1504_v59 = vpop.xlane.xlu1 %1503 }
 0x36d   : > { %v1540_v6 = vsub.f32 %v3472_v4, %v1504_v59 }
 0x36f   : > { %v3548_v7 = vpop.eup %2642  ;;  %v1561_v9 = vmul.f32 1.442695, %v1540_v6 }
 0x370   : > { %v1595_v10 = vsel %vm1486_vm7, %v3548_v7, 0.0 }
 0x371   : > { %2644 = vpow2.f32 %v1561_v9  ;;  %1596 = vadd.xlane.f32.xlu1 %v1595_v10 }
 0x374   : > { %v1507_v11 = vpop.xlane.xlu2 %1506 }
 0x375   : > { %v1541_v0 = vsub.f32 %v3477_v8, %v1507_v11 }
 0x377   : > { %v3553_v13 = vpop.eup %2644  ;;  %v1563_v14 = vmul.f32 1.442695, %v1541_v0 }
 0x378   : > { %v1598_v15 = vsel %vm1486_vm7, %v3553_v13, 0.0 }
 0x379   : > { %2646 = vpow2.f32 %v1563_v14  ;;  %1599 = vadd.xlane.f32.xlu2 %v1598_v15 }
 0x37c   : > { %v1510_v4 = vpop.xlane.xlu0 %1509 }
 0x37d   : > { %v1542_v17 = vsub.f32 %v3482_v12, %v1510_v4 }
 0x37f   : > { %v3558_v18 = vpop.eup %2646  ;;  %v1565_v19 = vmul.f32 1.442695, %v1542_v17 }
 0x380   : > { %v1601_v21 = vsel %vm1486_vm7, %v3558_v18, 0.0 }
 0x381   : > { %2648 = vpow2.f32 %v1565_v19  ;;  %1602 = vadd.xlane.f32.xlu0 %v1601_v21 }
 0x384   : > { %v1513_v8 = vpop.xlane.xlu1 %1512 }
 0x385   : > { %v1543_v22 = vsub.f32 %v3487_v16, %v1513_v8 }
 0x387   : > { %v3563_v23 = vpop.eup %2648  ;;  %v1567_v25 = vmul.f32 1.442695, %v1543_v22 }
 0x388   : > { %v1604_v26 = vsel %vm1486_vm7, %v3563_v23, 0.0 }
 0x389   : > { %2650 = vpow2.f32 %v1567_v25  ;;  %1605 = vadd.xlane.f32.xlu1 %v1604_v26 }
 0x38c   : > { %v1516_v12 = vpop.xlane.xlu2 %1515 }
 0x38d   : > { %v1544_v27 = vsub.f32 %v3492_v20, %v1516_v12 }
 0x38f   : > { %v3568_v29 = vpop.eup %2650  ;;  %v1569_v30 = vmul.f32 1.442695, %v1544_v27 }
 0x390   : > { %v1607_v31 = vsel %vm1486_vm7, %v3568_v29, 0.0 }
 0x391   : > { %2652 = vpow2.f32 %v1569_v30  ;;  %1608 = vadd.xlane.f32.xlu2 %v1607_v31 }
 0x394   : > { %v1519_v16 = vpop.xlane.xlu0 %1518 }
 0x395   : > { %v1545_v33 = vsub.f32 %v3497_v24, %v1519_v16 }
 0x397   : > { %v3573_v34 = vpop.eup %2652  ;;  %v1571_v35 = vmul.f32 1.442695, %v1545_v33 }
 0x398   : > { %v1610_v37 = vsel %vm1486_vm7, %v3573_v34, 0.0 }
 0x399   : > { %2654 = vpow2.f32 %v1571_v35  ;;  %1611 = vadd.xlane.f32.xlu0 %v1610_v37 }
 0x39c   : > { %v1522_v20 = vpop.xlane.xlu1 %1521 }
 0x39d   : > { %v1546_v38 = vsub.f32 %v3502_v28, %v1522_v20 }
 0x39f   : > { %v3578_v40 = vpop.eup %2654  ;;  %v1573_v42 = vmul.f32 1.442695, %v1546_v38 }
 0x3a0   : > { %v1613_v43 = vsel %vm1486_vm7, %v3578_v40, 0.0 }
 0x3a1   : > { %2656 = vpow2.f32 %v1573_v42  ;;  %1614 = vadd.xlane.f32.xlu1 %v1613_v43 }
 0x3a4   : > { %v1525_v24 = vpop.xlane.xlu2 %1524 }
 0x3a5   : > { %v1547_v44 = vsub.f32 %v3507_v32, %v1525_v24 }
 0x3a7   : > { %v3583_v45 = vpop.eup %2656  ;;  %v1575_v47 = vmul.f32 1.442695, %v1547_v44 }
 0x3a8   : > { %v1616_v48 = vsel %vm1486_vm7, %v3583_v45, 0.0 }
 0x3a9   : > { %2658 = vpow2.f32 %v1575_v47  ;;  %1617 = vadd.xlane.f32.xlu2 %v1616_v48 }
 0x3ac   : > { %v1528_v28 = vpop.xlane.xlu0 %1527 }
 0x3ad   : > { %v1548_v49 = vsub.f32 %v3512_v36, %v1528_v28 }
 0x3af   : > { %v3588_v53 = vpop.eup %2658  ;;  %v1577_v54 = vmul.f32 1.442695, %v1548_v49 }
 0x3b0   : > { %v1619_v41 = vsel %vm1486_vm7, %v3588_v53, 0.0 }
 0x3b1   : > { %2660 = vpow2.f32 %v1577_v54  ;;  %1620 = vadd.xlane.f32.xlu0 %v1619_v41 }
 0x3b4   : > { %v1531_v32 = vpop.xlane.xlu1 %1530 }
 0x3b5   : > { %v1549_v55 = vsub.f32 %v3517_v39, %v1531_v32 }
 0x3b7   : > { %v3595_v58 = vpop.eup %2660  ;;  %v1579_v52 = vmul.f32 1.442695, %v1549_v55 }
 0x3b8   : > { %v1622_v36 = vsel %vm1486_vm7, %v3595_v58, 0.0 }
 0x3b9   : > { %2662 = vpow2.f32 %v1579_v52  ;;  %1623 = vadd.xlane.f32.xlu1 %v1622_v36 }
 0x3ba   : > { %v1534_v62 = vpop.xlane.xlu2 %1533 }
 0x3bb   : > { %v1550_v63 = vsub.f32 %v3523_v46, %v1534_v62 }
 0x3bd   : > { %v1581_v39 = vmul.f32 1.442695, %v1550_v63 }
 0x3bf   : > { %v3601_v56 = vpop.eup %2662  ;;  %2664 = vpow2.f32 %v1581_v39 }
 0x3c0   : > { %v1625_v2 = vsel %vm1486_vm7, %v3601_v56, 0.0 }
 0x3c1   : > { %1626 = vadd.xlane.f32.xlu2 %v1625_v2 }
 0x3c2   : > { %v1585_v3 = vpop.xlane.xlu0 %1584 }
 0x3c3   : > { %2666 = vrcp.f32 %v1585_v3  ;;  %v1642_v11 = vand.u32 2147483648, %v1585_v3  ;;  %v1640_v14 = vand.u32 2147483647, %v1585_v3  ;;  %vm1636_vm9 = vweird.f32 %v1585_v3 }
 0x3c5   : > { %v3605_v5 = vpop.eup %2664  ;;  %v1643_v17 = vor.u32 1.1754944e-38, %v1642_v11  ;;  %vm1641_vm11 = vcmp.eq.f32.partialorder %v1640_v14, 8.507059e+37 }
 0x3c6   : > { %v1628_v59 = vsel %vm1486_vm7, %v3605_v5, 0.0 }
 0x3c7   : > { %1629 = vadd.xlane.f32.xlu0 %v1628_v59 }
 0x3c9   : > { %v2667_v6 = vpop.eup %2666 }
 0x3ca   : > { %v1632_v9 = vmul.f32 %v2667_v6, %v1585_v3  ;;  %v1588_v10 = vpop.xlane.xlu1 %1587  ;;  %vm1637_vm8 = vweird.f32 %v2667_v6 }
 0x3cb   : > { %2668 = vrcp.f32 %v1588_v10  ;;  %vm1638_vm10 = vmor %vm1636_vm9, %vm1637_vm8  ;;  %v1657_v12 = vand.u32 2147483648, %v1588_v10  ;;  %v1655_v30 = vand.u32 2147483647, %v1588_v10  ;;  %vm1651_vm13 = vweird.f32 %v1588_v10 }
 0x3cc   : > { %v1633_v46 = vsub.f32 1.0, %v1632_v9 }
 0x3cd   : > { %v1658_v33 = vor.u32 1.1754944e-38, %v1657_v12  ;;  %vm1656_vm15 = vcmp.eq.f32.partialorder %v1655_v30, 8.507059e+37 }
 0x3ce   : > { %v1634_v0 = vmul.f32 %v2667_v6, %v1633_v46 }
 0x3d0   : > { %v1635_v15 = vadd.f32 %v2667_v6, %v1634_v0 }
 0x3d1   : > { %v2669_v4 = vpop.eup %2668 }
 0x3d2   : > { %v1647_v19 = vmul.f32 %v2669_v4, %v1588_v10  ;;  %v1591_v21 = vpop.xlane.xlu2 %1590  ;;  %v1639_v8 = vsel %vm1638_vm10, %v2667_v6, %v1635_v15  ;;  %vm1652_vm12 = vweird.f32 %v2669_v4 }
 0x3d3   : > { %2670 = vrcp.f32 %v1591_v21  ;;  %v1644_v22 = vsel %vm1641_vm11, %v1643_v17, %v1639_v8  ;;  %vm1653_vm14 = vmor %vm1651_vm13, %vm1652_vm12  ;;  %v1672_v43 = vand.u32 2147483648, %v1591_v21  ;;  %v1670_v44 = vand.u32 2147483647, %v1591_v21 }
 0x3d4   : > { %v1648_v25 = vsub.f32 1.0, %v1647_v19  ;;  %v1645_v26 = vmul.f32 %v3528_v51, %v1644_v22  ;;  %vm1666_vm1 = vweird.f32 %v1591_v21 }
 0x3d5   : > { %v1673_v28 = vor.u32 1.1754944e-38, %v1672_v43  ;;  %vm1671_vm3 = vcmp.eq.f32.partialorder %v1670_v44, 8.507059e+37 }
 0x3d6   : > { %v1649_v27 = vmul.f32 %v2669_v4, %v1648_v25  ;;  %1905 = vperm.xlu1 %2539, %v1645_v26   ;;  %1871 = vst.msk [vmem:[%s3091_s17 + $0x18] sm:$0xff] %vm1486_vm7, %v1645_v26 }
 0x3d8   : > { %v1650_v31 = vadd.f32 %v2669_v4, %v1649_v27 }
 0x3d9   : > { %v2671_v16 = vpop.eup %2670  ;;  %2032 = vperm.xlu2 %2540, %v1645_v26  }
 0x3da   : > { %v1662_v35 = vmul.f32 %v2671_v16, %v1591_v21  ;;  %v1594_v37 = vpop.xlane.xlu0 %1593  ;;  %v1654_v20 = vsel %vm1653_vm14, %v2669_v4, %v1650_v31  ;;  %vm1667_vm0 = vweird.f32 %v2671_v16 }
 0x3db   : > { %2672 = vrcp.f32 %v1594_v37  ;;  %v1659_v51 = vsel %vm1656_vm15, %v1658_v33, %v1654_v20  ;;  %vm1668_vm2 = vmor %vm1666_vm1, %vm1667_vm0  ;;  %v1687_v52 = vand.u32 2147483648, %v1594_v37  ;;  %v1685_v62 = vand.u32 2147483647, %v1594_v37 }
 0x3dc   : > { %v1663_v38 = vsub.f32 1.0, %v1662_v35  ;;  %v1660_v42 = vmul.f32 %v3533_v50, %v1659_v51  ;;  %vm1681_vm6 = vweird.f32 %v1594_v37 }
 0x3dd   : > { %v1688_v39 = vor.u32 1.1754944e-38, %v1687_v52  ;;  %vm1686_vm9 = vcmp.eq.f32.partialorder %v1685_v62, 8.507059e+37 }
 0x3de   : > { %v1664_v24 = vmul.f32 %v2671_v16, %v1663_v38  ;;  %2542 = vset.pattern.permute.xlu1 %v2891_v60  ;;  %1872 = vst.msk [vmem:[%s3091_s17 + $0x38] sm:$0xff] %vm1486_vm7, %v1660_v42 }
 0x3df   : > { %2036 = vperm.xlu1 %2542, %v1660_v42  }
 0x3e0   : > { %v1665_v47 = vadd.f32 %v2671_v16, %v1664_v24 }
 0x3e1   : > { %v2673_v48 = vpop.eup %2672  ;;  %2541 = vset.pattern.permute.xlu2 %v2890_v57 }
 0x3e2   : > { %v1677_v49 = vmul.f32 %v2673_v48, %v1594_v37  ;;  %1910 = vperm.xlu2 %2541, %v1660_v42   ;;  %v1669_v50 = vsel %vm1668_vm2, %v2671_v16, %v1665_v47  ;;  %vm1682_vm4 = vweird.f32 %v2673_v48 }
 0x3e3   : > { %v1674_v54 = vsel %vm1671_vm3, %v1673_v28, %v1669_v50  ;;  %vm1683_vm8 = vmor %vm1681_vm6, %vm1682_vm4 }
 0x3e4   : > { %v1678_v41 = vsub.f32 1.0, %v1677_v49  ;;  %v1597_v32 = vpop.xlane.xlu1 %1596  ;;  %v1675_v55 = vmul.f32 %v3538_v61, %v1674_v54 }
 0x3e5   : > { %2674 = vrcp.f32 %v1597_v32  ;;  %v1702_v46 = vand.u32 2147483648, %v1597_v32  ;;  %v1700_v0 = vand.u32 2147483647, %v1597_v32  ;;  %vm1696_vm11 = vweird.f32 %v1597_v32 }
 0x3e6   : > { %v1679_v36 = vmul.f32 %v2673_v48, %v1678_v41  ;;  %1915 = vperm.xlu0 %2543, %v1675_v55   ;;  %1873 = vst.msk [vmem:[%s3091_s17 + $0x58] sm:$0xff] %vm1486_vm7, %v1675_v55 }
 0x3e7   : > { %2546 = vset.pattern.permute.xlu1 %v2890_v57  ;;  %v1703_v4 = vor.u32 1.1754944e-38, %v1702_v46  ;;  %vm1701_vm13 = vcmp.eq.f32.partialorder %v1700_v0, 8.507059e+37 }
 0x3e8   : > { %v1680_v63 = vadd.f32 %v2673_v48, %v1679_v36 }
 0x3ea   : > { %v1684_v2 = vsel %vm1683_vm8, %v2673_v48, %v1680_v63 }
 0x3eb   : > { %v2675_v3 = vpop.eup %2674  ;;  %v1689_v59 = vsel %vm1686_vm9, %v1688_v39, %v1684_v2 }
 0x3ec   : > { %v1692_v61 = vmul.f32 %v2675_v3, %v1597_v32  ;;  %v1600_v6 = vpop.xlane.xlu2 %1599  ;;  %v1690_v9 = vmul.f32 %v3542_v1, %v1689_v59  ;;  %vm1697_vm10 = vweird.f32 %v2675_v3 }
 0x3ed   : > { %2676 = vrcp.f32 %v1600_v6  ;;  %vm1698_vm12 = vmor %vm1696_vm11, %vm1697_vm10  ;;  %v1717_v25 = vand.u32 2147483648, %v1600_v6  ;;  %v1715_v12 = vand.u32 2147483647, %v1600_v6  ;;  %vm1711_vm15 = vweird.f32 %v1600_v6 }
 0x3ee   : > { %v1693_v10 = vsub.f32 1.0, %v1692_v61  ;;  %2544 = vset.pattern.permute.xlu0 %v2891_v60  ;;  %1920 = vperm.xlu2 %2541, %v1690_v9   ;;  %1874 = vst.msk [vmem:[%s3091_s17 + $0x78] sm:$0xff] %vm1486_vm7, %v1690_v9 }
 0x3ef   : > { %2040 = vperm.xlu0 %2544, %v1675_v55   ;;  %v1718_v31 = vor.u32 1.1754944e-38, %v1717_v25  ;;  %vm1716_vm1 = vcmp.eq.f32.partialorder %v1715_v12, 8.507059e+37 }
 0x3f0   : > { %v1694_v11 = vmul.f32 %v2675_v3, %v1693_v10 }
 0x3f2   : > { %v1695_v14 = vadd.f32 %v2675_v3, %v1694_v11 }
 0x3f3   : > { %v2677_v15 = vpop.eup %2676 }
 0x3f4   : > { %v1707_v17 = vmul.f32 %v2677_v15, %v1600_v6  ;;  %v1603_v1 = vpop.xlane.xlu0 %1602  ;;  %v1699_v19 = vsel %vm1698_vm12, %v2675_v3, %v1695_v14  ;;  %vm1712_vm14 = vweird.f32 %v2677_v15 }
 0x3f5   : > { %2678 = vrcp.f32 %v1603_v1  ;;  %v1704_v21 = vsel %vm1701_vm13, %v1703_v4, %v1699_v19  ;;  %vm1713_vm0 = vmor %vm1711_vm15, %vm1712_vm14  ;;  %v1732_v51 = vand.u32 2147483648, %v1603_v1  ;;  %v1730_v42 = vand.u32 2147483647, %v1603_v1 }
 0x3f6   : > { %v1708_v8 = vsub.f32 1.0, %v1707_v17  ;;  %2545 = vset.pattern.permute.xlu2 %v2891_v60  ;;  %v1705_v22 = vmul.f32 %v3548_v7, %v1704_v21  ;;  %vm1726_vm3 = vweird.f32 %v1603_v1 }
 0x3f7   : > { %2044 = vperm.xlu2 %2545, %v1690_v9   ;;  %v1733_v44 = vor.u32 1.1754944e-38, %v1732_v51  ;;  %vm1731_vm6 = vcmp.eq.f32.partialorder %v1730_v42, 8.507059e+37 }
 0x3f8   : > { %v1709_v26 = vmul.f32 %v2677_v15, %v1708_v8  ;;  %1875 = vst.msk [vmem:[%s3091_s17 + $0x98] sm:$0xff] %vm1486_vm7, %v1705_v22  ;;  %1925 = vperm.xlu1 %2546, %v1705_v22  }
 0x3fa   : > { %v1710_v27 = vadd.f32 %v2677_v15, %v1709_v26 }
 0x3fb   : > { %v2679_v30 = vpop.eup %2678 }
 0x3fc   : > { %v1722_v16 = vmul.f32 %v2679_v30, %v1603_v1  ;;  %v1606_v33 = vpop.xlane.xlu1 %1605  ;;  %v1714_v35 = vsel %vm1713_vm0, %v2677_v15, %v1710_v27  ;;  %vm1727_vm2 = vweird.f32 %v2679_v30 }
 0x3fd   : > { %2680 = vrcp.f32 %v1606_v33  ;;  %v1719_v7 = vsel %vm1716_vm1, %v1718_v31, %v1714_v35  ;;  %vm1728_vm4 = vmor %vm1726_vm3, %vm1727_vm2  ;;  %v1747_v54 = vand.u32 2147483648, %v1606_v33  ;;  %v1745_v32 = vand.u32 2147483647, %v1606_v33 }
 0x3fe   : > { %v1723_v37 = vsub.f32 1.0, %v1722_v16  ;;  %v1720_v20 = vmul.f32 %v3553_v13, %v1719_v7  ;;  %vm1741_vm9 = vweird.f32 %v1606_v33 }
 0x3ff   : > { %2548 = vset.pattern.permute.xlu2 %v2890_v57  ;;  %v1748_v36 = vor.u32 1.1754944e-38, %v1747_v54  ;;  %vm1746_vm11 = vcmp.eq.f32.partialorder %v1745_v32, 8.507059e+37 }
 0x400   : > { %v1724_v38 = vmul.f32 %v2679_v30, %v1723_v37  ;;  %2547 = vset.pattern.permute.xlu1 %v2891_v60  ;;  %1876 = vst.msk [vmem:[%s3091_s17 + $0xb8] sm:$0xff] %vm1486_vm7, %v1720_v20  ;;  %1930 = vperm.xlu2 %2548, %v1720_v20  }
 0x401   : > { %2048 = vperm.xlu1 %2547, %v1705_v22  }
 0x402   : > { %v1725_v43 = vadd.f32 %v2679_v30, %v1724_v38 }
 0x403   : > { %v2681_v24 = vpop.eup %2680 }
 0x404   : > { %v1737_v47 = vmul.f32 %v2681_v24, %v1606_v33  ;;  %v1609_v13 = vpop.xlane.xlu2 %1608  ;;  %v1729_v48 = vsel %vm1728_vm4, %v2679_v30, %v1725_v43  ;;  %vm1742_vm8 = vweird.f32 %v2681_v24 }
 0x405   : > { %2682 = vrcp.f32 %v1609_v13  ;;  %v1734_v28 = vsel %vm1731_vm6, %v1733_v44, %v1729_v48  ;;  %vm1743_vm10 = vmor %vm1741_vm9, %vm1742_vm8  ;;  %v1762_v59 = vand.u32 2147483648, %v1609_v13  ;;  %v1760_v6 = vand.u32 2147483647, %v1609_v13 }
 0x406   : > { %v1738_v49 = vsub.f32 1.0, %v1737_v47  ;;  %v1735_v50 = vmul.f32 %v3558_v18, %v1734_v28  ;;  %vm1756_vm13 = vweird.f32 %v1609_v13 }
 0x407   : > { %v1763_v46 = vor.u32 1.1754944e-38, %v1762_v59  ;;  %vm1761_vm15 = vcmp.eq.f32.partialorder %v1760_v6, 8.507059e+37 }
 0x408   : > { %v1739_v41 = vmul.f32 %v2681_v24, %v1738_v49  ;;  %2549 = vset.pattern.permute.xlu2 %v2891_v60  ;;  %1877 = vst.msk [vmem:[%s3091_s17 + $0xd8] sm:$0xff] %vm1486_vm7, %v1735_v50 }
 0x409   : > { %2550 = vset.pattern.permute.xlu1 %v2890_v57  ;;  %2052 = vperm.xlu2 %2549, %v1720_v20  }
 0x40a   : > { %1935 = vperm.xlu1 %2550, %v1735_v50   ;;  %v1740_v55 = vadd.f32 %v2681_v24, %v1739_v41 }
 0x40b   : > { %v2683_v52 = vpop.eup %2682 }
 0x40c   : > { %v1752_v62 = vmul.f32 %v2683_v52, %v1609_v13  ;;  %v1612_v18 = vpop.xlane.xlu0 %1611  ;;  %v1744_v63 = vsel %vm1743_vm10, %v2681_v24, %v1740_v55  ;;  %vm1757_vm12 = vweird.f32 %v2683_v52 }
 0x40d   : > { %2684 = vrcp.f32 %v1612_v18  ;;  %v1749_v39 = vsel %vm1746_vm11, %v1748_v36, %v1744_v63  ;;  %vm1758_vm14 = vmor %vm1756_vm13, %vm1757_vm12  ;;  %v1777_v17 = vand.u32 2147483648, %v1612_v18  ;;  %v1775_v19 = vand.u32 2147483647, %v1612_v18 }
 0x40e   : > { %v1753_v2 = vsub.f32 1.0, %v1752_v62  ;;  %v1750_v3 = vmul.f32 %v3563_v23, %v1749_v39  ;;  %vm1771_vm1 = vweird.f32 %v1612_v18 }
 0x40f   : > { %v1778_v22 = vor.u32 1.1754944e-38, %v1777_v17  ;;  %vm1776_vm3 = vcmp.eq.f32.partialorder %v1775_v19, 8.507059e+37 }
 0x410   : > { %v1754_v61 = vmul.f32 %v2683_v52, %v1753_v2  ;;  %2060 = vperm.xlu0 %2544, %v1750_v3   ;;  %1878 = vst.msk [vmem:[%s3091_s17 + $0xf8] sm:$0xff] %vm1486_vm7, %v1750_v3 }
 0x411   : > { %2552 = vset.pattern.permute.xlu2 %v2890_v57 }
 0x412   : > { %1940 = vperm.xlu2 %2552, %v1750_v3   ;;  %2551 = vset.pattern.permute.xlu1 %v2891_v60  ;;  %v1755_v9 = vadd.f32 %v2683_v52, %v1754_v61 }
 0x413   : > { %v2685_v10 = vpop.eup %2684  ;;  %2056 = vperm.xlu1 %2551, %v1735_v50  }
 0x414   : > { %v1767_v23 = vmul.f32 %v2685_v10, %v1612_v18  ;;  %v1615_v11 = vpop.xlane.xlu1 %1614  ;;  %v1759_v0 = vsel %vm1758_vm14, %v2683_v52, %v1755_v9  ;;  %vm1772_vm0 = vweird.f32 %v2685_v10 }
 0x415   : > { %2686 = vrcp.f32 %v1615_v11  ;;  %v1764_v14 = vsel %vm1761_vm15, %v1763_v46, %v1759_v0  ;;  %vm1773_vm2 = vmor %vm1771_vm1, %vm1772_vm0  ;;  %v1792_v31 = vand.u32 2147483648, %v1615_v11  ;;  %v1790_v33 = vand.u32 2147483647, %v1615_v11 }
 0x416   : > { %v1768_v15 = vsub.f32 1.0, %v1767_v23  ;;  %v1765_v4 = vmul.f32 %v3568_v29, %v1764_v14  ;;  %vm1786_vm6 = vweird.f32 %v1615_v11 }
 0x417   : > { %v1793_v37 = vor.u32 1.1754944e-38, %v1792_v31  ;;  %vm1791_vm9 = vcmp.eq.f32.partialorder %v1790_v33, 8.507059e+37 }
 0x418   : > { %v1769_v1 = vmul.f32 %v2685_v10, %v1768_v15  ;;  %1879 = vst.msk [vmem:[%s3091_s17 + $0x118] sm:$0xff] %vm1486_vm7, %v1765_v4  ;;  %2555 = vset.pattern.permute.xlu0 %v2890_v57 }
 0x41a   : > { %2554 = vset.pattern.permute.xlu2 %v2891_v60  ;;  %v1770_v21 = vadd.f32 %v2685_v10, %v1769_v1 }
 0x41b   : > { %v2687_v8 = vpop.eup %2686  ;;  %2064 = vperm.xlu2 %2554, %v1765_v4   ;;  %2553 = vset.pattern.permute.xlu1 %v2890_v57 }
 0x41c   : > { %v1782_v29 = vmul.f32 %v2687_v8, %v1615_v11  ;;  %v1618_v25 = vpop.xlane.xlu2 %1617  ;;  %1945 = vperm.xlu1 %2553, %v1765_v4   ;;  %v1774_v26 = vsel %vm1773_vm2, %v2685_v10, %v1770_v21  ;;  %vm1787_vm4 = vweird.f32 %v2687_v8 }
 0x41d   : > { %2688 = vrcp.f32 %v1618_v25  ;;  %v1779_v12 = vsel %vm1776_vm3, %v1778_v22, %v1774_v26  ;;  %vm1788_vm8 = vmor %vm1786_vm6, %vm1787_vm4  ;;  %v1807_v24 = vand.u32 2147483648, %v1618_v25  ;;  %v1805_v47 = vand.u32 2147483647, %v1618_v25 }
 0x41e   : > { %v1783_v27 = vsub.f32 1.0, %v1782_v29  ;;  %v1780_v30 = vmul.f32 %v3573_v34, %v1779_v12  ;;  %vm1801_vm11 = vweird.f32 %v1618_v25 }
 0x41f   : > { %v1808_v28 = vor.u32 1.1754944e-38, %v1807_v24  ;;  %vm1806_vm13 = vcmp.eq.f32.partialorder %v1805_v47, 8.507059e+37  ;;  %v1888_v47 = vld [vmem:[%s3091_s17 + $0x20] sm:$0xff] }
 0x420   : > { %v1784_v16 = vmul.f32 %v2687_v8, %v1783_v27  ;;  %1950 = vperm.xlu0 %2555, %v1780_v30   ;;  %1880 = vst.msk [vmem:[%s3091_s17 + $0x138] sm:$0xff] %vm1486_vm7, %v1780_v30 }
 0x422   : > { %v1785_v35 = vadd.f32 %v2687_v8, %v1784_v16 }
 0x423   : > { %v2689_v7 = vpop.eup %2688  ;;  %2557 = vset.pattern.permute.xlu2 %v2890_v57 }
 0x424   : > { %v1797_v20 = vmul.f32 %v2689_v7, %v1618_v25  ;;  %2556 = vset.pattern.permute.xlu1 %v2891_v60  ;;  %v1621_v51 = vpop.xlane.xlu0 %1620  ;;  %v1789_v34 = vsel %vm1788_vm8, %v2687_v8, %v1785_v35  ;;  %vm1802_vm10 = vweird.f32 %v2689_v7 }
 0x425   : > { %2690 = vrcp.f32 %v1621_v51  ;;  %2068 = vperm.xlu1 %2556, %v1780_v30   ;;  %v1794_v38 = vsel %vm1791_vm9, %v1793_v37, %v1789_v34  ;;  %vm1803_vm12 = vmor %vm1801_vm11, %vm1802_vm10  ;;  %v1822_v55 = vand.u32 2147483648, %v1621_v51  ;;  %v1820_v36 = vand.u32 2147483647, %v1621_v51 }
 0x426   : > { %v1798_v42 = vsub.f32 1.0, %v1797_v20  ;;  %v1795_v43 = vmul.f32 %v3578_v40, %v1794_v38  ;;  %vm1816_vm15 = vweird.f32 %v1621_v51 }
 0x427   : > { %v1823_v63 = vor.u32 1.1754944e-38, %v1822_v55  ;;  %vm1821_vm1 = vcmp.eq.f32.partialorder %v1820_v36, 8.507059e+37 }
 0x428   : > { %v1799_v44 = vmul.f32 %v2689_v7, %v1798_v42  ;;  %1881 = vst.msk [vmem:[%s3091_s17 + $0x158] sm:$0xff] %vm1486_vm7, %v1795_v43  ;;  %1955 = vperm.xlu2 %2557, %v1795_v43   ;;  %2558 = vset.pattern.permute.xlu0 %v2891_v60 }
 0x429   : > { %2072 = vperm.xlu0 %2558, %v1795_v43  }
 0x42a   : > { %v1800_v13 = vadd.f32 %v2689_v7, %v1799_v44 }
 0x42b   : > { %v2691_v48 = vpop.eup %2690 }
 0x42c   : > { %v1812_v49 = vmul.f32 %v2691_v48, %v1621_v51  ;;  %v1624_v50 = vpop.xlane.xlu1 %1623  ;;  %v1804_v54 = vsel %vm1803_vm12, %v2689_v7, %v1800_v13  ;;  %vm1817_vm14 = vweird.f32 %v2691_v48  ;;  %v1887_v7 = vld [vmem:[%s3091_s17] sm:$0xff]  ;;  %v2016_v13 = vld [vmem:[%s3091_s17 + $0x28] sm:$0xff] }
 0x42d   : > { %2692 = vrcp.f32 %v1624_v50  ;;  %2559 = vset.pattern.permute.xlu1 %v2890_v57  ;;  %v1809_v40 = vsel %vm1806_vm13, %v1808_v28, %v1804_v54  ;;  %vm1818_vm0 = vmor %vm1816_vm15, %vm1817_vm14  ;;  %v1837_v6 = vand.u32 2147483648, %v1624_v50  ;;  %v1835_v10 = vand.u32 2147483647, %v1624_v50 }
 0x42e   : > { %v1813_v41 = vsub.f32 1.0, %v1812_v49  ;;  %v1810_v32 = vmul.f32 %v3583_v45, %v1809_v40  ;;  %vm1831_vm3 = vweird.f32 %v1624_v50 }
 0x42f   : > { %v1838_v0 = vor.u32 1.1754944e-38, %v1837_v6  ;;  %vm1836_vm6 = vcmp.eq.f32.partialorder %v1835_v10, 8.507059e+37 }
 0x430   : > { %v1814_v52 = vmul.f32 %v2691_v48, %v1813_v41  ;;  %2560 = vset.pattern.permute.xlu2 %v2891_v60  ;;  %1882 = vst.msk [vmem:[%s3091_s17 + $0x178] sm:$0xff] %vm1486_vm7, %v1810_v32  ;;  %1960 = vperm.xlu1 %2559, %v1810_v32  }
 0x431   : > { %2076 = vperm.xlu2 %2560, %v1810_v32   ;;  %2561 = vset.pattern.permute.xlu0 %v2890_v57 }
 0x432   : > { %v1815_v62 = vadd.f32 %v2691_v48, %v1814_v52 }
 0x433   : > { %v2693_v18 = vpop.eup %2692 }
 0x434   : > { %v1827_v39 = vmul.f32 %v2693_v18, %v1624_v50  ;;  %v1627_v45 = vpop.xlane.xlu2 %1626  ;;  %v1819_v2 = vsel %vm1818_vm0, %v2691_v48, %v1815_v62  ;;  %vm1832_vm2 = vweird.f32 %v2693_v18  ;;  %v1890_v50 = vld [vmem:[%s3091_s17 + $0x60] sm:$0xff] }
 0x435   : > { %2694 = vrcp.f32 %v1627_v45  ;;  %v1824_v3 = vsel %vm1821_vm1, %v1823_v63, %v1819_v2  ;;  %vm1833_vm4 = vmor %vm1831_vm3, %vm1832_vm2  ;;  %v1852_v19 = vand.u32 2147483648, %v1627_v45  ;;  %v1850_v8 = vand.u32 2147483647, %v1627_v45  ;;  %v1889_v62 = vld [vmem:[%s3091_s17 + $0x40] sm:$0xff] }
 0x436   : > { %v1828_v59 = vsub.f32 1.0, %v1827_v39  ;;  %v1825_v61 = vmul.f32 %v3588_v53, %v1824_v3  ;;  %vm1846_vm9 = vweird.f32 %v1627_v45  ;;  %v1892_v2 = vld [vmem:[%s3091_s17 + $0xa0] sm:$0xff] }
 0x437   : > { %v1853_v26 = vor.u32 1.1754944e-38, %v1852_v19  ;;  %vm1851_vm11 = vcmp.eq.f32.partialorder %v1850_v8, 8.507059e+37 }
 0x438   : > { %v1829_v9 = vmul.f32 %v2693_v18, %v1828_v59  ;;  %2562 = vset.pattern.permute.xlu1 %v2891_v60  ;;  %1965 = vperm.xlu0 %2561, %v1825_v61   ;;  %1883 = vst.msk [vmem:[%s3091_s17 + $0x198] sm:$0xff] %vm1486_vm7, %v1825_v61  ;;  %v2020_v59 = vld [vmem:[%s3091_s17 + $0xa8] sm:$0xff] }
 0x439   : > { %2080 = vperm.xlu1 %2562, %v1825_v61   ;;  %2563 = vset.pattern.permute.xlu2 %v2890_v57 }
 0x43a   : > { %v1630_v46 = vpop.xlane.xlu0 %1629  ;;  %v1830_v23 = vadd.f32 %v2693_v18, %v1829_v9 }
 0x43b   : > { %v2695_v11 = vpop.eup %2694  ;;  %2696 = vrcp.f32 %v1630_v46  ;;  %v1867_v30 = vand.u32 2147483648, %v1630_v46  ;;  %v1865_v35 = vand.u32 2147483647, %v1630_v46  ;;  %vm1861_vm13 = vweird.f32 %v1630_v46 }
 0x43c   : > { %v1842_v53 = vmul.f32 %v2695_v11, %v1627_v45  ;;  %v2033_v14 = vpop.permute.xlu2 %2032  ;;  %v1834_v15 = vsel %vm1833_vm4, %v2693_v18, %v1830_v23  ;;  %vm1847_vm8 = vweird.f32 %v2695_v11  ;;  %v2017_v18 = vld [vmem:[%s3091_s17 + $0x48] sm:$0xff] }
 0x43d   : > { %v1839_v4 = vsel %vm1836_vm6, %v1838_v0, %v1834_v15  ;;  %vm1848_vm10 = vmor %vm1846_vm9, %vm1847_vm8  ;;  %v1868_v51 = vor.u32 1.1754944e-38, %v1867_v30  ;;  %vm1866_vm15 = vcmp.eq.f32.partialorder %v1865_v35, 8.507059e+37  ;;  %v2019_v23 = vld [vmem:[%s3091_s17 + $0x88] sm:$0xff] }
 0x43e   : > { %v1843_v17 = vsub.f32 1.0, %v1842_v53  ;;  %v1840_v1 = vmul.f32 %v3595_v58, %v1839_v4 }
 0x440   : > { %v1844_v21 = vmul.f32 %v2695_v11, %v1843_v17  ;;  %1884 = vst.msk [vmem:[%s3091_s17 + $0x1b8] sm:$0xff] %vm1486_vm7, %v1840_v1  ;;  %1970 = vperm.xlu2 %2563, %v1840_v1   ;;  %v1894_v17 = vld [vmem:[%s3091_s17 + $0xe0] sm:$0xff] }
 0x441   : > { %v2697_v22 = vpop.eup %2696  ;;  %2564 = vset.pattern.permute.xlu1 %v2890_v57  ;;  %v2015_v57 = vld [vmem:[%s3091_s17 + $0x8] sm:$0xff] }
 0x442   : > { %v1857_v29 = vmul.f32 %v2697_v22, %v1630_v46  ;;  %v1845_v25 = vadd.f32 %v2695_v11, %v1844_v21  ;;  %vm1862_vm12 = vweird.f32 %v2697_v22  ;;  %v2095_v34 = vmul.f32 %v2033_v14, %v2015_v57  ;;  %v1891_v46 = vld [vmem:[%s3091_s17 + $0x80] sm:$0xff] }
 0x443   : > { %vm1863_vm14 = vmor %vm1861_vm13, %vm1862_vm12 }
 0x444   : > { %v1858_v12 = vsub.f32 1.0, %v1857_v29  ;;  %v1911_v58 = vpop.permute.xlu2 %1910  ;;  %v1849_v27 = vsel %vm1848_vm10, %v2695_v11, %v1845_v25  ;;  %v2021_v25 = vld [vmem:[%s3091_s17 + $0xc8] sm:$0xff] }
 0x445   : > { %v1854_v31 = vsel %vm1851_vm11, %v1853_v26, %v1849_v27  ;;  %v1984_v28 = vmul.f32 %v1911_v58, %v1888_v47 }
 0x446   : > { %v1859_v16 = vmul.f32 %v2697_v22, %v1858_v12  ;;  %v1855_v33 = vmul.f32 %v3601_v56, %v1854_v31  ;;  %v2023_v31 = vld [vmem:[%s3091_s17 + $0x108] sm:$0xff] }
 0x448   : > { %v1906_v37 = vpop.permute.xlu1 %1905  ;;  %2566 = vset.pattern.permute.xlu2 %v2891_v60  ;;  %1885 = vst.msk [vmem:[%s3091_s17 + $0x1d8] sm:$0xff] %vm1486_vm7, %v1855_v33  ;;  %1975 = vperm.xlu1 %2564, %v1855_v33   ;;  %v1860_v20 = vadd.f32 %v2697_v22, %v1859_v16  ;;  %v1895_v16 = vld [vmem:[%s3091_s17 + $0x100] sm:$0xff] }
 0x449   : > { %v1983_v38 = vmul.f32 %v1906_v37, %v1887_v7  ;;  %2088 = vperm.xlu2 %2566, %v1855_v33  }
 0x44a   : > { %v1864_v56 = vsel %vm1863_vm14, %v2697_v22, %v1860_v20  ;;  %v1893_v22 = vld [vmem:[%s3091_s17 + $0xc0] sm:$0xff] }
 0x44b   : > { %v2111_v42 = vadd.f32 %v2095_v34, %v1983_v38  ;;  %v1869_v43 = vsel %vm1866_vm15, %v1868_v51, %v1864_v56  ;;  %v1896_v51 = vld [vmem:[%s3091_s17 + $0x120] sm:$0xff]  ;;  %v2024_v34 = vld [vmem:[%s3091_s17 + $0x128] sm:$0xff] }
 0x44c   : > { %v1921_v24 = vpop.permute.xlu2 %1920  ;;  %v1870_v44 = vmul.f32 %v3605_v5, %v1869_v43  ;;  %v2018_v5 = vld [vmem:[%s3091_s17 + $0x68] sm:$0xff] }
 0x44d   : > { %2127 = vst.msk [vmem:[%s3091_s17 + $0x10] sm:$0xff] %vm899_vm5, %v2111_v42  ;;  %v1986_v41 = vmul.f32 %v1921_v24, %v1890_v50  ;;  %v1897_v24 = vld [vmem:[%s3091_s17 + $0x140] sm:$0xff]  ;;  %v2026_v50 = vld [vmem:[%s3091_s17 + $0x168] sm:$0xff] }
 0x44e   : > { %1980 = vperm.xlu0 %2561, %v1870_v44   ;;  %1886 = vst.msk [vmem:[%s3091_s17 + $0x1f8] sm:$0xff] %vm1486_vm7, %v1870_v44 }
 0x450   : > { %2567 = vset.pattern.permute.xlu1 %v2891_v60 }
 0x451   : > { %v2037_v48 = vpop.permute.xlu1 %2036  ;;  %2092 = vperm.xlu1 %2567, %v1870_v44   ;;  %v2025_v44 = vld [vmem:[%s3091_s17 + $0x148] sm:$0xff] }
 0x452   : > { %v2096_v49 = vmul.f32 %v2037_v48, %v2016_v13 }
 0x454   : > { %v2112_v54 = vadd.f32 %v2096_v49, %v1984_v28  ;;  %v2045_v40 = vpop.permute.xlu2 %2044 }
 0x455   : > { %v2098_v32 = vmul.f32 %v2045_v40, %v2018_v5 }
 0x456   : > { %2128 = vst.msk [vmem:[%s3091_s17 + $0x30] sm:$0xff] %vm899_vm5, %v2112_v54  ;;  %2565 = vset.pattern.permute.xlu0 %v2891_v60  ;;  %v1898_v54 = vld [vmem:[%s3091_s17 + $0x160] sm:$0xff] }
 0x457   : > { %v2114_v55 = vadd.f32 %v2098_v32, %v1986_v41  ;;  %2084 = vperm.xlu0 %2565, %v1840_v1   ;;  %v2022_v1 = vld [vmem:[%s3091_s17 + $0xe8] sm:$0xff] }
 0x458   : > { %v1916_v52 = vpop.permute.xlu0 %1915 }
 0x459   : > { %2130 = vst.msk [vmem:[%s3091_s17 + $0x70] sm:$0xff] %vm899_vm5, %v2114_v55  ;;  %v1985_v39 = vmul.f32 %v1916_v52, %v1889_v62  ;;  %v1899_v55 = vld [vmem:[%s3091_s17 + $0x180] sm:$0xff]  ;;  %v2027_v62 = vld [vmem:[%s3091_s17 + $0x188] sm:$0xff] }
 0x45c   : > { %v1931_v36 = vpop.permute.xlu2 %1930 }
 0x45d   : > { %v1988_v61 = vmul.f32 %v1931_v36, %v1892_v2 }
 0x461   : > { %v2041_v63 = vpop.permute.xlu0 %2040 }
 0x462   : > { %v2097_v45 = vmul.f32 %v2041_v63, %v2017_v18 }
 0x464   : > { %v2113_v3 = vadd.f32 %v2097_v45, %v1985_v39  ;;  %v2053_v60 = vpop.permute.xlu2 %2052 }
 0x465   : > { %v2100_v6 = vmul.f32 %v2053_v60, %v2020_v59  ;;  %v1901_v59 = vld [vmem:[%s3091_s17 + $0x1c0] sm:$0xff] }
 0x466   : > { %2129 = vst.msk [vmem:[%s3091_s17 + $0x50] sm:$0xff] %vm899_vm5, %v2113_v3  ;;  %v2029_v3 = vld [vmem:[%s3091_s17 + $0x1c8] sm:$0xff] }
 0x467   : > { %v2116_v9 = vadd.f32 %v2100_v6, %v1988_v61 }
 0x469   : > { %2132 = vst.msk [vmem:[%s3091_s17 + $0xb0] sm:$0xff] %vm899_vm5, %v2116_v9 }
 0x46a   : > { %v1926_v10 = vpop.permute.xlu1 %1925 }
 0x46b   : > { %v1987_v0 = vmul.f32 %v1926_v10, %v1891_v46  ;;  %v1902_v46 = vld [vmem:[%s3091_s17 + $0x1e0] sm:$0xff] }
 0x46c   : > { %v1941_v4 = vpop.permute.xlu2 %1940 }
 0x46d   : > { %v1990_v21 = vmul.f32 %v1941_v4, %v1894_v17  ;;  %v2028_v4 = vld [vmem:[%s3091_s17 + $0x1a8] sm:$0xff] }
 0x473   : > { %v2049_v11 = vpop.permute.xlu1 %2048 }
 0x474   : > { %v2099_v53 = vmul.f32 %v2049_v11, %v2019_v23  ;;  %v2030_v23 = vld [vmem:[%s3091_s17 + $0x1e8] sm:$0xff] }
 0x475   : > { %v2065_v30 = vpop.permute.xlu2 %2064 }
 0x476   : > { %v2115_v14 = vadd.f32 %v2099_v53, %v1987_v0  ;;  %v2103_v35 = vmul.f32 %v2065_v30, %v2023_v31 }
 0x478   : > { %2131 = vst.msk [vmem:[%s3091_s17 + $0x90] sm:$0xff] %vm899_vm5, %v2115_v14 }
 0x47c   : > { %v1936_v15 = vpop.permute.xlu1 %1935 }
 0x47d   : > { %v1989_v12 = vmul.f32 %v1936_v15, %v1893_v22  ;;  %v1900_v15 = vld [vmem:[%s3091_s17 + $0x1a0] sm:$0xff] }
 0x482   : > { %v2061_v19 = vpop.permute.xlu0 %2060  ;;  %v1956_v20 = vpop.permute.xlu2 %1955 }
 0x483   : > { %v2102_v8 = vmul.f32 %v2061_v19, %v2022_v1  ;;  %v1993_v13 = vmul.f32 %v1956_v20, %v1897_v24 }
 0x485   : > { %v2118_v29 = vadd.f32 %v2102_v8, %v1990_v21  ;;  %v2057_v26 = vpop.permute.xlu1 %2056 }
 0x486   : > { %v2101_v58 = vmul.f32 %v2057_v26, %v2021_v25 }
 0x487   : > { %2134 = vst.msk [vmem:[%s3091_s17 + $0xf0] sm:$0xff] %vm899_vm5, %v2118_v29 }
 0x488   : > { %v2117_v27 = vadd.f32 %v2101_v58, %v1989_v12 }
 0x48a   : > { %2133 = vst.msk [vmem:[%s3091_s17 + $0xd0] sm:$0xff] %vm899_vm5, %v2117_v27 }
 0x48b   : > { %v2077_v49 = vpop.permute.xlu2 %2076 }
 0x48c   : > { %v2106_v40 = vmul.f32 %v2077_v49, %v2026_v50 }
 0x48e   : > { %v1946_v33 = vpop.permute.xlu1 %1945 }
 0x48f   : > { %v1991_v57 = vmul.f32 %v1946_v33, %v1895_v16 }
 0x491   : > { %v2119_v7 = vadd.f32 %v2103_v35, %v1991_v57 }
 0x492   : > { %v1951_v37 = vpop.permute.xlu0 %1950 }
 0x493   : > { %2135 = vst.msk [vmem:[%s3091_s17 + $0x110] sm:$0xff] %vm899_vm5, %v2119_v7  ;;  %v1992_v56 = vmul.f32 %v1951_v37, %v1896_v51 }
 0x497   : > { %v2069_v38 = vpop.permute.xlu1 %2068 }
 0x498   : > { %v2104_v42 = vmul.f32 %v2069_v38, %v2024_v34 }
 0x49a   : > { %v2120_v43 = vadd.f32 %v2104_v42, %v1992_v56  ;;  %v1971_v39 = vpop.permute.xlu2 %1970 }
 0x49b   : > { %v2073_v47 = vpop.permute.xlu0 %2072  ;;  %v1996_v1 = vmul.f32 %v1971_v39, %v1900_v15 }
 0x49c   : > { %2136 = vst.msk [vmem:[%s3091_s17 + $0x130] sm:$0xff] %vm899_vm5, %v2120_v43  ;;  %v2105_v48 = vmul.f32 %v2073_v47, %v2025_v44 }
 0x49e   : > { %v2121_v28 = vadd.f32 %v2105_v48, %v1993_v13 }
 0x4a0   : > { %2137 = vst.msk [vmem:[%s3091_s17 + $0x150] sm:$0xff] %vm899_vm5, %v2121_v28 }
 0x4a2   : > { %v1961_v5 = vpop.permute.xlu1 %1960 }
 0x4a3   : > { %v1994_v41 = vmul.f32 %v1961_v5, %v1898_v54  ;;  %v2089_v2 = vpop.permute.xlu2 %2088 }
 0x4a4   : > { %v2109_v61 = vmul.f32 %v2089_v2, %v2029_v3 }
 0x4a5   : > { %v2122_v32 = vadd.f32 %v2106_v40, %v1994_v41 }
 0x4a7   : > { %2138 = vst.msk [vmem:[%s3091_s17 + $0x170] sm:$0xff] %vm899_vm5, %v2122_v32 }
 0x4aa   : > { %v1966_v52 = vpop.permute.xlu0 %1965 }
 0x4ab   : > { %v1995_v36 = vmul.f32 %v1966_v52, %v1899_v55  ;;  %v2081_v18 = vpop.permute.xlu1 %2080 }
 0x4ac   : > { %v2107_v63 = vmul.f32 %v2081_v18, %v2027_v62 }
 0x4ae   : > { %v2123_v45 = vadd.f32 %v2107_v63, %v1995_v36 }
 0x4b0   : > { %2139 = vst.msk [vmem:[%s3091_s17 + $0x190] sm:$0xff] %vm899_vm5, %v2123_v45 }
 0x4ba   : > { %v1976_v60 = vpop.permute.xlu1 %1975 }
 0x4bb   : > { %v1997_v6 = vmul.f32 %v1976_v60, %v1901_v59 }
 0x4bd   : > { %v2125_v9 = vadd.f32 %v2109_v61, %v1997_v6 }
 0x4bf   : > { %2141 = vst.msk [vmem:[%s3091_s17 + $0x1d0] sm:$0xff] %vm899_vm5, %v2125_v9 }
 0x4c0   : > { %v1981_v10 = vpop.permute.xlu0 %1980 }
 0x4c1   : > { %v1998_v0 = vmul.f32 %v1981_v10, %v1902_v46 }
 0x4c3   : > { %v2093_v11 = vpop.permute.xlu1 %2092 }
 0x4c4   : > { %v2110_v53 = vmul.f32 %v2093_v11, %v2030_v23 }
 0x4c6   : > { %v2126_v14 = vadd.f32 %v2110_v53, %v1998_v0 }
 0x4c8   : > { %2142 = vst.msk [vmem:[%s3091_s17 + $0x1f0] sm:$0xff] %vm899_vm5, %v2126_v14 }
 0x4c9   : > { %v2085_v17 = vpop.permute.xlu0 %2084 }
 0x4ca   : > { %v2108_v19 = vmul.f32 %v2085_v17, %v2028_v4 }
 0x4cc   : > { %v2124_v21 = vadd.f32 %v2108_v19, %v1996_v1 }
 0x4ce   : > { %2140 = vst.msk [vmem:[%s3091_s17 + $0x1b0] sm:$0xff] %vm899_vm5, %v2124_v21 }
 0x4cf PF: > { %s3838_s8 = sld [smem:[#allocation16_spill]]  ;;  %s2157_s13 = sshll.u32 %s3091_s17, 4  ;;  %s2158_s13 = int_to_ptr.vmem [resolvable:$true] %s2157_s13 }
 0x4d0   : > { %s3839_s14 = sld [smem:[#allocation25_spill]]  ;;  %s2144_s12 = scalar_lea.sflag [#allocation6], %s417_s27 }
 0x4d5   : > { %s2389_s10 = sshll.u32 %s3838_s8, 9 }
 0x4d6   : > { %s3840_s23 = smov %s3839_s14  ;;  %s2156_s11 = scalar_lea.hbm %s3839_s14, %s2389_s10 }
 0x4d7   : > { %s2159_s19 = sshll.u32 %s2156_s11, 4  ;;  %s2778_s2 = scalar_lea.hbm %s3840_s23, 1536  ;;  %s2160_s19 = int_to_ptr.hbm [resolvable:$true] %s2159_s19 }
 0x4d8   : > { %s2772_s16 = sshra.s32 %s2160_s19, 4  ;;  %s2773_s16 = int_to_ptr.hbm [resolvable:$true] %s2772_s16 }
 0x4d9   : > { %s2774_s21 = scalar_lea.hbm %s2773_s16, 512  ;;  %p2779_p0 = scmp.lt.s32.totalorder %s2773_s16, %s3840_s23 }
 0x4da   : > { %p2775_p10 = scmp.ne.s32.totalorder %s2773_s16, %s2774_s21  ;;  %p2780_p1 = scmp.lt.s32.totalorder %s2778_s2, %s2774_s21 }
 0x4dc   : > { %p2776_p11 = pnand %p2775_p10, %p3021_p12  ;;  %p2781_p4 = por %p2780_p1, %p2779_p0 }
 0x4de   : > { %p2777_p13 = pneg %p2776_p11 }
 0x4e0   : > { %p2782_p3 = pnand %p2781_p4, %p2777_p13 }
 0x4e2   : > { %2785 = shalt.err (!%p2782_p3)
}
 0x4e3   : > { %s2892_s27 = smov 512   ;;  %s2893_s17 = smov 32  }
 0x4e4   : > { %2428 = dma.vmem_to_hbm [thread:$0]  (%p3021_p12), %s2158_s13, 8192, %s2160_s19, %s2144_s12, %s2892_s27, %s2892_s27, %s2893_s17  }
 0x4e5 PF: > { %s3841_s24 = sld [smem:[#allocation13_spill]]  ;;  %p2442_p5 = scmp.ge.s32.totalorder %s2884_s15, 2 }
 0x4e7   : > { %p2438_p6 = pnand %p2442_p5, %p3034_p2 }
 0x4e9   : > { %p2439_p8 = pneg %p2438_p6 }
 0x4eb   : > { %s2174_s10 = sand.u32 1, %s3841_s24  }
 0x4ec   : > { %s2175_s18 = scalar_lea.sflag [#allocation6], %s2174_s10 }
 0x4ed   : > { %2839 = dma.done.wait (%p2439_p8), %s2175_s18, 8192  }
 0x4ee   : > { %2841 = vsyncadd (%p2439_p8), %s2175_s18, 4294959104  ;;  %s27_s15 = sadd.s32 1, %s2884_s15   ;;  %s3843_s29 = sld [smem:[#allocation14_spill]] }
 0x4ef   : > { %p24_p7 = scmp.ge.s32.totalorder %s27_s15, 11   ;;  %s3844_s14 = sld [smem:[#allocation21_spill]] }
 0x4f0   : > { %s3845_s11 = sld [smem:[#allocation15_spill]]  ;;  %s3851_s27 = smov %s2848_s28 }
 0x4f1   : > { %s3846_s10 = sld [smem:[#allocation22_spill]]  ;;  %s3854_s30 = smov %s2860_s9 }
 0x4f2   : > { %s3847_s13 = sld [smem:[#allocation17_spill]] }
 0x4f3   : > { %s3848_s12 = sld [smem:[#allocation18_spill]] }
 0x4f4   : > { %s3849_s19 = sld [smem:[#allocation19_spill]]  ;;  %s3852_s28 = smov %s3843_s29 }
 0x4f5   : > { %s3850_s16 = sld [smem:[#allocation20_spill]]  ;;  %s3853_s29 = smov %s3844_s14 }
 0x4f6   : > { %s3855_s9 = smov %s3845_s11 }
 0x4f7   :  { %26 = sbr.rel (!%p24_p7) target bundleno = 14 (0xe), region = 124 }
 0x4f8   : > { %s3856_s11 = smov %s3847_s13 }
 0x4fa   : > { %s3857_s13 = smov %s3849_s19 }
 0x4fb   : > { %s3858_s14 = smov %s3850_s16 }
 0x4fc   :  { %2181 = vsyncpa [#allocation5], 1 }
 0x4fd   :  { %2183 = vsyncpa [#allocation5 + $0x1], 1 }
 0x4fe   :  { %2184 = vsyncpa [#allocation8], 1 }
 0x4ff   :  { %2186 = vsyncpa [#allocation8 + $0x1], 1 }
 0x500   :  { %2187 = vsyncpa [#allocation6], 1 }
 0x501   :  { %2189 = vsyncpa [#allocation6 + $0x1], 1 }

</bundles_post_ra>
